<compile_context>
chip_gen: v7x
topology: tpu7x:2x2x1
jax: 0.10.0
libtpu: 0.0.40
codegen_flags: <defaults>
</compile_context>

<pallas_src>
import functools

import numpy as np

import jax
import jax.numpy as jnp
from jax import lax
from jax.experimental import pallas as pl
from jax.experimental.pallas import tpu as pltpu

F32 = jnp.float32
BF16 = jnp.bfloat16


# ----------------------------- in-kernel helpers -----------------------------

def _roll_lanes(x, shift):
    # Cyclic roll along the last (lane) axis, jnp.roll sign convention.
    n = x.shape[-1]
    return pltpu.roll(x, shift % n, axis=x.ndim - 1)


def _mm(w_ref, x):
    # (Cout, K) @ (K, N) on the MXU with bf16 inputs / f32 accumulation.
    return jnp.dot(w_ref[...], x.astype(BF16), preferred_element_type=F32)


def _bn_relu(x, scale_ref, shift_ref):
    # Eval-mode BatchNorm1d folded to a per-channel affine, then ReLU (f32 VPU).
    return jnp.maximum(x * scale_ref[...] + shift_ref[...], 0.0)


def _conv3_c1(x, w_ref, b_ref, mf, ml):
    # Conv1d(1 -> Cout, k=3, p=1) at dilation 1 via VPU broadcasts (Cin == 1).
    xm = _roll_lanes(x, 1) * mf
    xp = _roll_lanes(x, -1) * ml
    return w_ref[0] * xm + w_ref[1] * x + w_ref[2] * xp + b_ref[...]


def _conv3(x, w_ref, b_ref, d, mf, ml):
    # Conv1d(k=3, p=1) on the dilated layout (valid lanes = multiples of d).
    # w_ref is the tap-fused (Cout, 3*Cin) weight -> one MXU matmul per layer.
    xm = _roll_lanes(x, d) * mf      # x[i-1], zeroed at the first sample of each signal
    xp = _roll_lanes(x, -d) * ml     # x[i+1], zeroed at the last sample of each signal
    stacked = jnp.concatenate([xm, x, xp], axis=0)            # (3*Cin, N)
    return _mm(w_ref, stacked) + b_ref[...]


def _maxpool2(x, d):
    # MaxPool1d(2, 2) on the dilated layout: valid lanes go d -> 2d.
    # Valid output lanes only ever read valid level-d lanes, so no mask needed.
    return jnp.maximum(x, _roll_lanes(x, -d))


def _deconv3_s2(x, w_ref, b_ref, d_in, ml, me):
    # ConvTranspose1d(k=3, s=2, p=1, op=1): valid lanes go d_in -> d_in // 2.
    # w_ref is the fused block weight [[W1, 0], [W2, W0]] of shape (2*Cout, 2*Cin):
    #   y[2j]   = W1 x[j]
    #   y[2j+1] = W2 x[j] + W0 x[j+1]        (x past the end of a signal = 0)
    # The interleave is a roll by d_out plus a 0/1 blend (me == 1 on even lanes).
    cout = w_ref.shape[0] // 2
    xn = _roll_lanes(x, -d_in) * ml                           # x[j+1]
    y = _mm(w_ref, jnp.concatenate([x, xn], axis=0))          # (2*Cout, N)
    y_even = y[:cout]
    y_odd = _roll_lanes(y[cout:], d_in // 2)
    return y_odd + (y_even - y_odd) * me + b_ref[...]


# --------------------------------- kernel -------------------------------------

def _autoencoder_kernel(x_ref, *refs):
    (w1, b1, s1, t1,
     w2, b2, s2, t2,
     w3, b3, s3, t3,
     dw1, db1, ds1, dt1,
     dw2, db2, ds2, dt2,
     dw3, db3, ds3, dt3,
     w4, b4,
     mf_r, ml1_r, ml2_r, ml4_r, ml8_r, me2_r, me4_r, me8_r) = refs[:-1]
    o_ref = refs[-1]

    # Load each (1, N) mask exactly once.
    mf, ml1, ml2, ml4 = mf_r[...], ml1_r[...], ml2_r[...], ml4_r[...]
    ml8, me2, me4, me8 = ml8_r[...], me2_r[...], me4_r[...], me8_r[...]

    x = x_ref[...].astype(F32)                                     # (1, N)  d=1

    # ---- encoder (Dropout layers are identity in eval mode) ----
    h = _bn_relu(_conv3_c1(x, w1, b1, mf, ml1), s1, t1)            # (16,N)  d=1
    h = _maxpool2(h, 1)                                            #         d=2
    h = _bn_relu(_conv3(h, w2, b2, 2, mf, ml2), s2, t2)            # (8, N)  d=2
    h = _maxpool2(h, 2)                                            #         d=4
    h = _bn_relu(_conv3(h, w3, b3, 4, mf, ml4), s3, t3)            # (8, N)  d=4
    h = _maxpool2(h, 4)                                            #         d=8

    # ---- decoder ----
    h = _bn_relu(_deconv3_s2(h, dw1, db1, 8, ml8, me8), ds1, dt1)  # (8, N)  d=4
    h = _bn_relu(_deconv3_s2(h, dw2, db2, 4, ml4, me4), ds2, dt2)  # (8, N)  d=2
    h = _bn_relu(_deconv3_s2(h, dw3, db3, 2, ml2, me2), ds3, dt3)  # (16,N)  d=1
    y = _conv3(h, w4, b4, 1, mf, ml1)                              # (1, N)  d=1

    # Sigmoid via tanh: overflow-free, runs on the EUP slot.
    o_ref[...] = (0.5 * (jnp.tanh(0.5 * y) + 1.0)).astype(o_ref.dtype)


# --------------------------- host-built operands -------------------------------

def _build_masks(n, sig_len):
    idx = np.arange(n)

    def row(cond):
        return cond.astype(np.float32)[None, :]

    mf = row(idx % sig_len != 0)                  # first-sample mask (all levels)
    ml1 = row(idx % sig_len != sig_len - 1)       # last-sample mask, dilation 1
    ml2 = row(idx % sig_len != sig_len - 2)       # dilation 2
    ml4 = row(idx % sig_len != sig_len - 4)       # dilation 4
    ml8 = row(idx % sig_len != sig_len - 8)       # dilation 8
    me2 = row(idx % 2 == 0)                       # even-lane selects for the deconvs
    me4 = row(idx % 4 == 0)
    me8 = row(idx % 8 == 0)
    return mf, ml1, ml2, ml4, ml8, me2, me4, me8


def _fuse_conv(w):
    # (3, Cout, Cin) -> (Cout, 3*Cin) bf16; column blocks multiply [x_-1; x; x_+1].
    return jnp.concatenate([w[0], w[1], w[2]], axis=1).astype(BF16)


def _fuse_deconv(w):
    # (3, Cout, Cin) -> (2*Cout, 2*Cin) bf16 block [[W1, 0], [W2, W0]]
    # acting on [x; x_next] -> [y_even; y_odd].
    z = jnp.zeros(w.shape[1:], w.dtype)
    blk = jnp.concatenate([jnp.concatenate([w[1], z], axis=1),
                           jnp.concatenate([w[2], w[0]], axis=1)], axis=0)
    return blk.astype(BF16)


def _prep_kernel_params(params):
    (w1, b1, s1, t1, w2, b2, s2, t2, w3, b3, s3, t3,
     dw1, db1, ds1, dt1, dw2, db2, ds2, dt2, dw3, db3, ds3, dt3,
     w4, b4) = params
    return [w1, b1, s1, t1,                  # first conv keeps (3,16,1) f32 (VPU path)
            _fuse_conv(w2), b2, s2, t2,
            _fuse_conv(w3), b3, s3, t3,
            _fuse_deconv(dw1), db1, ds1, dt1,
            _fuse_deconv(dw2), db2, ds2, dt2,
            _fuse_deconv(dw3), db3, ds3, dt3,
            _fuse_conv(w4), b4]


def _pick_tb(batch, sig_len):
    cands = [t for t in range(1, batch + 1)
             if batch % t == 0 and (t * sig_len) % 128 == 0]
    if not cands:
        raise ValueError("need a batch tile tb with B % tb == 0 and tb*L % 128 == 0")
    # Prefer >= 4 grid steps (feeds both v7x TensorCores and overlaps the per-step
    # I/O DMAs); otherwise take the widest tile (single-TC v5e/v6e: amortize the
    # ~0.35 us per-step overhead with a wider lane dimension).
    for gmin in (4, 2, 1):
        ok = [t for t in cands if batch // t >= gmin]
        if ok:
            return max(ok)
    return cands[-1]


def _zero_map(b, *, ndim):
    return (0,) * ndim


# --------------------------------- wrapper ------------------------------------

def conv_autoencoder_forward(x, params, *, tb=None):
    """x: (B, 1, L) float32 with L % 8 == 0.  Returns (B, 1, L) float32."""
    B, C, L = x.shape
    assert C == 1, "ConvAutoencoder expects a single input channel"
    assert L % 8 == 0, "signal length must be divisible by 8 (three MaxPool(2) stages)"
    if tb is None:
        tb = _pick_tb(B, L)
    assert B % tb == 0 and (tb * L) % 128 == 0
    g = B // tb
    n = tb * L                       # lane width of every activation (>= 128, % 128 == 0)

    kparams = _prep_kernel_params(params)
    consts = [jnp.asarray(m) for m in _build_masks(n, L)]
    ops = kparams + consts

    # Concatenate tb consecutive signals along the lane axis (free reshape).
    x_g = x.reshape(g, 1, n)

    in_specs = [pl.BlockSpec((None, 1, n), lambda b: (b, 0, 0))]
    in_specs += [pl.BlockSpec(p.shape, functools.partial(_zero_map, ndim=p.ndim))
                 for p in ops]
    out_spec = pl.BlockSpec((None, 1, n), lambda b: (b, 0, 0))

    grid_spec = pltpu.PrefetchScalarGridSpec(
        num_scalar_prefetch=0,
        grid=(g,),
        in_specs=in_specs,
        out_specs=out_spec,
    )

    # All MXU matmuls run at the full lane width n (dilated layout).
    mxu_flops = 2 * n * (8 * 48 + 8 * 24 + 16 * 16 + 16 * 16 + 32 * 16 + 1 * 48)
    vpu_flops = 2 * n * 16 * 3 + 80 * n       # first-conv broadcasts + elementwise work
    cost = pl.CostEstimate(
        flops=int(g * (mxu_flops + vpu_flops)),
        transcendentals=int(g * n),
        bytes_accessed=int(2 * B * L * 4
                           + sum(int(p.size) * p.dtype.itemsize for p in ops)),
    )

    out = pl.pallas_call(
        _autoencoder_kernel,
        out_shape=jax.ShapeDtypeStruct((g, 1, n), jnp.float32),
        grid_spec=grid_spec,
        compiler_params=pltpu.CompilerParams(
            dimension_semantics=("parallel",),
            vmem_limit_bytes=32 * 1024 * 1024,
        ),
        cost_estimate=cost,
    )(x_g, *ops)
    return out.reshape(B, 1, L)


# --------------------------- deterministic params -----------------------------

def init_params(key):
    ks = iter(jax.random.split(key, 40))

    def conv(cout, cin):
        w = jax.random.normal(next(ks), (cout, cin, 3), F32) / jnp.sqrt(3.0 * cin)
        b = 0.05 * jax.random.normal(next(ks), (cout,), F32)
        return jnp.transpose(w, (2, 0, 1)), b.reshape(cout, 1)   # -> (3, Cout, Cin)

    def deconv(cin, cout):
        w = jax.random.normal(next(ks), (cin, cout, 3), F32) / jnp.sqrt(3.0 * cin)
        b = 0.05 * jax.random.normal(next(ks), (cout,), F32)
        return jnp.transpose(w, (2, 1, 0)), b.reshape(cout, 1)   # -> (3, Cout, Cin)

    def bn(c):
        gamma = 1.0 + 0.1 * jax.random.normal(next(ks), (c,), F32)
        beta = 0.1 * jax.random.normal(next(ks), (c,), F32)
        mean = 0.1 * jax.random.normal(next(ks), (c,), F32)
        var = jax.random.uniform(next(ks), (c,), F32, minval=0.5, maxval=1.5)
        scale = gamma / jnp.sqrt(var + 1e-5)
        shift = beta - mean * scale
        return scale.reshape(c, 1), shift.reshape(c, 1)

    p = []
    w, b = conv(16, 1);   s, t = bn(16); p += [w, b, s, t]
    w, b = conv(8, 16);   s, t = bn(8);  p += [w, b, s, t]
    w, b = conv(8, 8);    s, t = bn(8);  p += [w, b, s, t]
    w, b = deconv(8, 8);  s, t = bn(8);  p += [w, b, s, t]
    w, b = deconv(8, 8);  s, t = bn(8);  p += [w, b, s, t]
    w, b = deconv(8, 16); s, t = bn(16); p += [w, b, s, t]
    w, b = conv(1, 16);   p += [w, b]
    return p


# ------------------------- pure-JAX reference (host) ---------------------------

def reference_forward(x, params):
    (w1, b1, s1, t1, w2, b2, s2, t2, w3, b3, s3, t3,
     dw1, db1, ds1, dt1, dw2, db2, ds2, dt2, dw3, db3, ds3, dt3,
     w4, b4) = params
    hp = lax.Precision.HIGHEST

    def conv3(x, w, b):
        xm = jnp.pad(x, ((0, 0), (0, 0), (1, 0)))[:, :, :-1]
        xp = jnp.pad(x, ((0, 0), (0, 0), (0, 1)))[:, :, 1:]
        y = (jnp.einsum('oc,bcl->bol', w[0], xm, precision=hp)
             + jnp.einsum('oc,bcl->bol', w[1], x, precision=hp)
             + jnp.einsum('oc,bcl->bol', w[2], xp, precision=hp))
        return y + b

    def bnrelu(x, s, t):
        return jnp.maximum(x * s + t, 0.0)

    def pool(x):
        B, C, L = x.shape
        return x.reshape(B, C, L // 2, 2).max(axis=-1)

    def deconv(x, w, b):
        xn = jnp.pad(x, ((0, 0), (0, 0), (0, 1)))[:, :, 1:]
        ye = jnp.einsum('oc,bcl->bol', w[1], x, precision=hp)
        yo = (jnp.einsum('oc,bcl->bol', w[2], x, precision=hp)
              + jnp.einsum('oc,bcl->bol', w[0], xn, precision=hp))
        B, C, L = ye.shape
        y = jnp.stack([ye, yo], axis=-1).reshape(B, C, 2 * L)
        return y + b

    h = bnrelu(conv3(x, w1, b1), s1, t1); h = pool(h)
    h = bnrelu(conv3(h, w2, b2), s2, t2); h = pool(h)
    h = bnrelu(conv3(h, w3, b3), s3, t3); h = pool(h)
    h = bnrelu(deconv(h, dw1, db1), ds1, dt1)
    h = bnrelu(deconv(h, dw2, db2), ds2, dt2)
    h = bnrelu(deconv(h, dw3, db3), ds3, dt3)
    y = conv3(h, w4, b4)
    return 0.5 * (jnp.tanh(0.5 * y) + 1.0)


# ----------------------------------- main --------------------------------------

if __name__ == "__main__":
    key = jax.random.PRNGKey(0)
    pkey, xkey = jax.random.split(key)

    params = init_params(pkey)

    B, L = 16, 128                  # auto tile: tb=4 -> 4 grid steps, 512-lane tiles
    x = jax.random.normal(xkey, (B, 1, L), dtype=jnp.float32)

    y = conv_autoencoder_forward(x, params)
    y = jax.block_until_ready(y)

    assert y.shape == (B, 1, L), y.shape
    assert bool(jnp.all(jnp.isfinite(y)))
    assert bool(jnp.all((y >= 0.0) & (y <= 1.0)))      # sigmoid output range

    y_ref = jax.block_until_ready(reference_forward(x, params))
    err = float(jnp.max(jnp.abs(y - y_ref)))
    # bf16 MXU inputs (f32 accumulation) drift ~1e-2 vs the f32 reference; the
    # tolerance below still catches any structural/indexing error (O(0.1-0.5)).
    assert err < 4e-2, f"max abs diff vs reference too large: {err}"

    print("KERNEL_OK")
</pallas_src>

<mosaic_0001>
module attributes {stable_mosaic.version = 11 : i64} {
  func.func @_autoencoder_kernel(%arg0: i32, %arg1: memref<1x1x512xf32, #tpu.memory_space<vmem>>, %arg2: memref<3x16x1xf32, #tpu.memory_space<vmem>>, %arg3: memref<16x1xf32, #tpu.memory_space<vmem>>, %arg4: memref<16x1xf32, #tpu.memory_space<vmem>>, %arg5: memref<16x1xf32, #tpu.memory_space<vmem>>, %arg6: memref<8x48xbf16, #tpu.memory_space<vmem>>, %arg7: memref<8x1xf32, #tpu.memory_space<vmem>>, %arg8: memref<8x1xf32, #tpu.memory_space<vmem>>, %arg9: memref<8x1xf32, #tpu.memory_space<vmem>>, %arg10: memref<8x24xbf16, #tpu.memory_space<vmem>>, %arg11: memref<8x1xf32, #tpu.memory_space<vmem>>, %arg12: memref<8x1xf32, #tpu.memory_space<vmem>>, %arg13: memref<8x1xf32, #tpu.memory_space<vmem>>, %arg14: memref<16x16xbf16, #tpu.memory_space<vmem>>, %arg15: memref<8x1xf32, #tpu.memory_space<vmem>>, %arg16: memref<8x1xf32, #tpu.memory_space<vmem>>, %arg17: memref<8x1xf32, #tpu.memory_space<vmem>>, %arg18: memref<16x16xbf16, #tpu.memory_space<vmem>>, %arg19: memref<8x1xf32, #tpu.memory_space<vmem>>, %arg20: memref<8x1xf32, #tpu.memory_space<vmem>>, %arg21: memref<8x1xf32, #tpu.memory_space<vmem>>, %arg22: memref<32x16xbf16, #tpu.memory_space<vmem>>, %arg23: memref<16x1xf32, #tpu.memory_space<vmem>>, %arg24: memref<16x1xf32, #tpu.memory_space<vmem>>, %arg25: memref<16x1xf32, #tpu.memory_space<vmem>>, %arg26: memref<1x48xbf16, #tpu.memory_space<vmem>>, %arg27: memref<1x1xf32, #tpu.memory_space<vmem>>, %arg28: memref<1x512xf32, #tpu.memory_space<vmem>>, %arg29: memref<1x512xf32, #tpu.memory_space<vmem>>, %arg30: memref<1x512xf32, #tpu.memory_space<vmem>>, %arg31: memref<1x512xf32, #tpu.memory_space<vmem>>, %arg32: memref<1x512xf32, #tpu.memory_space<vmem>>, %arg33: memref<1x512xf32, #tpu.memory_space<vmem>>, %arg34: memref<1x512xf32, #tpu.memory_space<vmem>>, %arg35: memref<1x512xf32, #tpu.memory_space<vmem>>, %arg36: memref<1x1x512xf32, #tpu.memory_space<vmem>>) attributes {dimension_semantics = [#tpu.dimension_semantics<parallel>], iteration_bounds = array<i64: 4>, scalar_prefetch = 0 : i64, scratch_operands = 0 : i64, tpu.core_type = #tpu.core_type<tc>, window_params = [{transform_indices = @transform_0, window_bounds = array<i64: 1, 1, 512>}, {pipeline_mode = #tpu.pipeline_mode<synchronous>, transform_indices = @transform_1, window_bounds = array<i64: 3, 16, 1>}, {pipeline_mode = #tpu.pipeline_mode<synchronous>, transform_indices = @transform_2, window_bounds = array<i64: 16, 1>}, {pipeline_mode = #tpu.pipeline_mode<synchronous>, transform_indices = @transform_3, window_bounds = array<i64: 16, 1>}, {pipeline_mode = #tpu.pipeline_mode<synchronous>, transform_indices = @transform_4, window_bounds = array<i64: 16, 1>}, {pipeline_mode = #tpu.pipeline_mode<synchronous>, transform_indices = @transform_5, window_bounds = array<i64: 8, 48>}, {pipeline_mode = #tpu.pipeline_mode<synchronous>, transform_indices = @transform_6, window_bounds = array<i64: 8, 1>}, {pipeline_mode = #tpu.pipeline_mode<synchronous>, transform_indices = @transform_7, window_bounds = array<i64: 8, 1>}, {pipeline_mode = #tpu.pipeline_mode<synchronous>, transform_indices = @transform_8, window_bounds = array<i64: 8, 1>}, {pipeline_mode = #tpu.pipeline_mode<synchronous>, transform_indices = @transform_9, window_bounds = array<i64: 8, 24>}, {pipeline_mode = #tpu.pipeline_mode<synchronous>, transform_indices = @transform_10, window_bounds = array<i64: 8, 1>}, {pipeline_mode = #tpu.pipeline_mode<synchronous>, transform_indices = @transform_11, window_bounds = array<i64: 8, 1>}, {pipeline_mode = #tpu.pipeline_mode<synchronous>, transform_indices = @transform_12, window_bounds = array<i64: 8, 1>}, {pipeline_mode = #tpu.pipeline_mode<synchronous>, transform_indices = @transform_13, window_bounds = array<i64: 16, 16>}, {pipeline_mode = #tpu.pipeline_mode<synchronous>, transform_indices = @transform_14, window_bounds = array<i64: 8, 1>}, {pipeline_mode = #tpu.pipeline_mode<synchronous>, transform_indices = @transform_15, window_bounds = array<i64: 8, 1>}, {pipeline_mode = #tpu.pipeline_mode<synchronous>, transform_indices = @transform_16, window_bounds = array<i64: 8, 1>}, {pipeline_mode = #tpu.pipeline_mode<synchronous>, transform_indices = @transform_17, window_bounds = array<i64: 16, 16>}, {pipeline_mode = #tpu.pipeline_mode<synchronous>, transform_indices = @transform_18, window_bounds = array<i64: 8, 1>}, {pipeline_mode = #tpu.pipeline_mode<synchronous>, transform_indices = @transform_19, window_bounds = array<i64: 8, 1>}, {pipeline_mode = #tpu.pipeline_mode<synchronous>, transform_indices = @transform_20, window_bounds = array<i64: 8, 1>}, {pipeline_mode = #tpu.pipeline_mode<synchronous>, transform_indices = @transform_21, window_bounds = array<i64: 32, 16>}, {pipeline_mode = #tpu.pipeline_mode<synchronous>, transform_indices = @transform_22, window_bounds = array<i64: 16, 1>}, {pipeline_mode = #tpu.pipeline_mode<synchronous>, transform_indices = @transform_23, window_bounds = array<i64: 16, 1>}, {pipeline_mode = #tpu.pipeline_mode<synchronous>, transform_indices = @transform_24, window_bounds = array<i64: 16, 1>}, {pipeline_mode = #tpu.pipeline_mode<synchronous>, transform_indices = @transform_25, window_bounds = array<i64: 1, 48>}, {pipeline_mode = #tpu.pipeline_mode<synchronous>, transform_indices = @transform_26, window_bounds = array<i64: 1, 1>}, {pipeline_mode = #tpu.pipeline_mode<synchronous>, transform_indices = @transform_27, window_bounds = array<i64: 1, 512>}, {pipeline_mode = #tpu.pipeline_mode<synchronous>, transform_indices = @transform_28, window_bounds = array<i64: 1, 512>}, {pipeline_mode = #tpu.pipeline_mode<synchronous>, transform_indices = @transform_29, window_bounds = array<i64: 1, 512>}, {pipeline_mode = #tpu.pipeline_mode<synchronous>, transform_indices = @transform_30, window_bounds = array<i64: 1, 512>}, {pipeline_mode = #tpu.pipeline_mode<synchronous>, transform_indices = @transform_31, window_bounds = array<i64: 1, 512>}, {pipeline_mode = #tpu.pipeline_mode<synchronous>, transform_indices = @transform_32, window_bounds = array<i64: 1, 512>}, {pipeline_mode = #tpu.pipeline_mode<synchronous>, transform_indices = @transform_33, window_bounds = array<i64: 1, 512>}, {pipeline_mode = #tpu.pipeline_mode<synchronous>, transform_indices = @transform_34, window_bounds = array<i64: 1, 512>}, {transform_indices = @transform_35, window_bounds = array<i64: 1, 1, 512>}]} {
    %c0 = arith.constant 0 : index
    %c0_0 = arith.constant 0 : index
    %0 = vector.load %arg28[%c0, %c0_0] : memref<1x512xf32, #tpu.memory_space<vmem>>, vector<1x512xf32>
    %c0_1 = arith.constant 0 : index
    %c0_2 = arith.constant 0 : index
    %1 = vector.load %arg29[%c0_1, %c0_2] : memref<1x512xf32, #tpu.memory_space<vmem>>, vector<1x512xf32>
    %c0_3 = arith.constant 0 : index
    %c0_4 = arith.constant 0 : index
    %2 = vector.load %arg30[%c0_3, %c0_4] : memref<1x512xf32, #tpu.memory_space<vmem>>, vector<1x512xf32>
    %c0_5 = arith.constant 0 : index
    %c0_6 = arith.constant 0 : index
    %3 = vector.load %arg31[%c0_5, %c0_6] : memref<1x512xf32, #tpu.memory_space<vmem>>, vector<1x512xf32>
    %c0_7 = arith.constant 0 : index
    %c0_8 = arith.constant 0 : index
    %4 = vector.load %arg32[%c0_7, %c0_8] : memref<1x512xf32, #tpu.memory_space<vmem>>, vector<1x512xf32>
    %c0_9 = arith.constant 0 : index
    %c0_10 = arith.constant 0 : index
    %5 = vector.load %arg33[%c0_9, %c0_10] : memref<1x512xf32, #tpu.memory_space<vmem>>, vector<1x512xf32>
    %c0_11 = arith.constant 0 : index
    %c0_12 = arith.constant 0 : index
    %6 = vector.load %arg34[%c0_11, %c0_12] : memref<1x512xf32, #tpu.memory_space<vmem>>, vector<1x512xf32>
    %c0_13 = arith.constant 0 : index
    %c0_14 = arith.constant 0 : index
    %7 = vector.load %arg35[%c0_13, %c0_14] : memref<1x512xf32, #tpu.memory_space<vmem>>, vector<1x512xf32>
    %c0_15 = arith.constant 0 : index
    %c0_16 = arith.constant 0 : index
    %c0_17 = arith.constant 0 : index
    %8 = vector.load %arg1[%c0_15, %c0_16, %c0_17] : memref<1x1x512xf32, #tpu.memory_space<vmem>>, vector<1x1x512xf32>
    %9 = vector.shape_cast %8 : vector<1x1x512xf32> to vector<1x512xf32>
    %c1_i32 = arith.constant 1 : i32
    %10 = tpu.dynamic_rotate %9 by %c1_i32 dim 1 : vector<1x512xf32>, i32 -> vector<1x512xf32>
    %11 = arith.mulf %10, %0 : vector<1x512xf32>
    %c511_i32 = arith.constant 511 : i32
    %12 = tpu.dynamic_rotate %9 by %c511_i32 dim 1 : vector<1x512xf32>, i32 -> vector<1x512xf32>
    %13 = arith.mulf %12, %1 : vector<1x512xf32>
    %c0_18 = arith.constant 0 : index
    %c0_19 = arith.constant 0 : index
    %c0_20 = arith.constant 0 : index
    %14 = vector.load %arg2[%c0_18, %c0_19, %c0_20] : memref<3x16x1xf32, #tpu.memory_space<vmem>>, vector<1x16x1xf32>
    %15 = vector.shape_cast %14 : vector<1x16x1xf32> to vector<16x1xf32>
    %16 = vector.broadcast %15 : vector<16x1xf32> to vector<16x512xf32>
    %17 = vector.broadcast %11 : vector<1x512xf32> to vector<16x512xf32>
    %18 = arith.mulf %16, %17 : vector<16x512xf32>
    %c1 = arith.constant 1 : index
    %c0_21 = arith.constant 0 : index
    %c0_22 = arith.constant 0 : index
    %19 = vector.load %arg2[%c1, %c0_21, %c0_22] : memref<3x16x1xf32, #tpu.memory_space<vmem>>, vector<1x16x1xf32>
    %20 = vector.shape_cast %19 : vector<1x16x1xf32> to vector<16x1xf32>
    %21 = vector.broadcast %20 : vector<16x1xf32> to vector<16x512xf32>
    %22 = vector.broadcast %9 : vector<1x512xf32> to vector<16x512xf32>
    %23 = arith.mulf %21, %22 : vector<16x512xf32>
    %24 = arith.addf %18, %23 : vector<16x512xf32>
    %c2 = arith.constant 2 : index
    %c0_23 = arith.constant 0 : index
    %c0_24 = arith.constant 0 : index
    %25 = vector.load %arg2[%c2, %c0_23, %c0_24] : memref<3x16x1xf32, #tpu.memory_space<vmem>>, vector<1x16x1xf32>
    %26 = vector.shape_cast %25 : vector<1x16x1xf32> to vector<16x1xf32>
    %27 = vector.broadcast %26 : vector<16x1xf32> to vector<16x512xf32>
    %28 = vector.broadcast %13 : vector<1x512xf32> to vector<16x512xf32>
    %29 = arith.mulf %27, %28 : vector<16x512xf32>
    %30 = arith.addf %24, %29 : vector<16x512xf32>
    %c0_25 = arith.constant 0 : index
    %c0_26 = arith.constant 0 : index
    %31 = vector.load %arg3[%c0_25, %c0_26] : memref<16x1xf32, #tpu.memory_space<vmem>>, vector<16x1xf32>
    %32 = vector.broadcast %31 : vector<16x1xf32> to vector<16x512xf32>
    %33 = arith.addf %30, %32 : vector<16x512xf32>
    %c0_27 = arith.constant 0 : index
    %c0_28 = arith.constant 0 : index
    %34 = vector.load %arg4[%c0_27, %c0_28] : memref<16x1xf32, #tpu.memory_space<vmem>>, vector<16x1xf32>
    %35 = vector.broadcast %34 : vector<16x1xf32> to vector<16x512xf32>
    %36 = arith.mulf %33, %35 : vector<16x512xf32>
    %c0_29 = arith.constant 0 : index
    %c0_30 = arith.constant 0 : index
    %37 = vector.load %arg5[%c0_29, %c0_30] : memref<16x1xf32, #tpu.memory_space<vmem>>, vector<16x1xf32>
    %38 = vector.broadcast %37 : vector<16x1xf32> to vector<16x512xf32>
    %39 = arith.addf %36, %38 : vector<16x512xf32>
    %cst = arith.constant 0.000000e+00 : f32
    %40 = vector.broadcast %cst : f32 to vector<16x512xf32>
    %41 = arith.maximumf %39, %40 : vector<16x512xf32>
    %c511_i32_31 = arith.constant 511 : i32
    %42 = tpu.dynamic_rotate %41 by %c511_i32_31 dim 1 : vector<16x512xf32>, i32 -> vector<16x512xf32>
    %43 = arith.maximumf %41, %42 : vector<16x512xf32>
    %c2_i32 = arith.constant 2 : i32
    %44 = tpu.dynamic_rotate %43 by %c2_i32 dim 1 : vector<16x512xf32>, i32 -> vector<16x512xf32>
    %45 = vector.broadcast %0 : vector<1x512xf32> to vector<16x512xf32>
    %46 = arith.mulf %44, %45 : vector<16x512xf32>
    %c510_i32 = arith.constant 510 : i32
    %47 = tpu.dynamic_rotate %43 by %c510_i32 dim 1 : vector<16x512xf32>, i32 -> vector<16x512xf32>
    %48 = vector.broadcast %2 : vector<1x512xf32> to vector<16x512xf32>
    %49 = arith.mulf %47, %48 : vector<16x512xf32>
    %50 = tpu.concatenate %46, %43, %49 in 0 : vector<16x512xf32>, vector<16x512xf32>, vector<16x512xf32> -> vector<48x512xf32>
    %c0_32 = arith.constant 0 : index
    %c0_33 = arith.constant 0 : index
    %51 = vector.load %arg6[%c0_32, %c0_33] : memref<8x48xbf16, #tpu.memory_space<vmem>>, vector<8x48xbf16>
    %52 = arith.truncf %50 : vector<48x512xf32> to vector<48x512xbf16>
    %cst_34 = arith.constant dense<0.000000e+00> : vector<8x512xf32>
    %53 = tpu.matmul %51, %52, %cst_34 {dimension_numbers = #tpu.dot_dimension_numbers<[1], [0], [0], [1], [0, 0, 1, 1], [], []>} : vector<8x48xbf16>, vector<48x512xbf16>, vector<8x512xf32> -> vector<8x512xf32>
    %c0_35 = arith.constant 0 : index
    %c0_36 = arith.constant 0 : index
    %54 = vector.load %arg7[%c0_35, %c0_36] : memref<8x1xf32, #tpu.memory_space<vmem>>, vector<8x1xf32>
    %55 = vector.broadcast %54 : vector<8x1xf32> to vector<8x512xf32>
    %56 = arith.addf %53, %55 : vector<8x512xf32>
    %c0_37 = arith.constant 0 : index
    %c0_38 = arith.constant 0 : index
    %57 = vector.load %arg8[%c0_37, %c0_38] : memref<8x1xf32, #tpu.memory_space<vmem>>, vector<8x1xf32>
    %58 = vector.broadcast %57 : vector<8x1xf32> to vector<8x512xf32>
    %59 = arith.mulf %56, %58 : vector<8x512xf32>
    %c0_39 = arith.constant 0 : index
    %c0_40 = arith.constant 0 : index
    %60 = vector.load %arg9[%c0_39, %c0_40] : memref<8x1xf32, #tpu.memory_space<vmem>>, vector<8x1xf32>
    %61 = vector.broadcast %60 : vector<8x1xf32> to vector<8x512xf32>
    %62 = arith.addf %59, %61 : vector<8x512xf32>
    %cst_41 = arith.constant 0.000000e+00 : f32
    %63 = vector.broadcast %cst_41 : f32 to vector<8x512xf32>
    %64 = arith.maximumf %62, %63 : vector<8x512xf32>
    %c510_i32_42 = arith.constant 510 : i32
    %65 = tpu.dynamic_rotate %64 by %c510_i32_42 dim 1 : vector<8x512xf32>, i32 -> vector<8x512xf32>
    %66 = arith.maximumf %64, %65 : vector<8x512xf32>
    %c4_i32 = arith.constant 4 : i32
    %67 = tpu.dynamic_rotate %66 by %c4_i32 dim 1 : vector<8x512xf32>, i32 -> vector<8x512xf32>
    %68 = vector.broadcast %0 : vector<1x512xf32> to vector<8x512xf32>
    %69 = arith.mulf %67, %68 : vector<8x512xf32>
    %c508_i32 = arith.constant 508 : i32
    %70 = tpu.dynamic_rotate %66 by %c508_i32 dim 1 : vector<8x512xf32>, i32 -> vector<8x512xf32>
    %71 = vector.broadcast %3 : vector<1x512xf32> to vector<8x512xf32>
    %72 = arith.mulf %70, %71 : vector<8x512xf32>
    %73 = tpu.concatenate %69, %66, %72 in 0 : vector<8x512xf32>, vector<8x512xf32>, vector<8x512xf32> -> vector<24x512xf32>
    %c0_43 = arith.constant 0 : index
    %c0_44 = arith.constant 0 : index
    %74 = vector.load %arg10[%c0_43, %c0_44] : memref<8x24xbf16, #tpu.memory_space<vmem>>, vector<8x24xbf16>
    %75 = arith.truncf %73 : vector<24x512xf32> to vector<24x512xbf16>
    %cst_45 = arith.constant dense<0.000000e+00> : vector<8x512xf32>
    %76 = tpu.matmul %74, %75, %cst_45 {dimension_numbers = #tpu.dot_dimension_numbers<[1], [0], [0], [1], [0, 0, 1, 1], [], []>} : vector<8x24xbf16>, vector<24x512xbf16>, vector<8x512xf32> -> vector<8x512xf32>
    %c0_46 = arith.constant 0 : index
    %c0_47 = arith.constant 0 : index
    %77 = vector.load %arg11[%c0_46, %c0_47] : memref<8x1xf32, #tpu.memory_space<vmem>>, vector<8x1xf32>
    %78 = vector.broadcast %77 : vector<8x1xf32> to vector<8x512xf32>
    %79 = arith.addf %76, %78 : vector<8x512xf32>
    %c0_48 = arith.constant 0 : index
    %c0_49 = arith.constant 0 : index
    %80 = vector.load %arg12[%c0_48, %c0_49] : memref<8x1xf32, #tpu.memory_space<vmem>>, vector<8x1xf32>
    %81 = vector.broadcast %80 : vector<8x1xf32> to vector<8x512xf32>
    %82 = arith.mulf %79, %81 : vector<8x512xf32>
    %c0_50 = arith.constant 0 : index
    %c0_51 = arith.constant 0 : index
    %83 = vector.load %arg13[%c0_50, %c0_51] : memref<8x1xf32, #tpu.memory_space<vmem>>, vector<8x1xf32>
    %84 = vector.broadcast %83 : vector<8x1xf32> to vector<8x512xf32>
    %85 = arith.addf %82, %84 : vector<8x512xf32>
    %cst_52 = arith.constant 0.000000e+00 : f32
    %86 = vector.broadcast %cst_52 : f32 to vector<8x512xf32>
    %87 = arith.maximumf %85, %86 : vector<8x512xf32>
    %c508_i32_53 = arith.constant 508 : i32
    %88 = tpu.dynamic_rotate %87 by %c508_i32_53 dim 1 : vector<8x512xf32>, i32 -> vector<8x512xf32>
    %89 = arith.maximumf %87, %88 : vector<8x512xf32>
    %c504_i32 = arith.constant 504 : i32
    %90 = tpu.dynamic_rotate %89 by %c504_i32 dim 1 : vector<8x512xf32>, i32 -> vector<8x512xf32>
    %91 = vector.broadcast %4 : vector<1x512xf32> to vector<8x512xf32>
    %92 = arith.mulf %90, %91 : vector<8x512xf32>
    %93 = tpu.concatenate %89, %92 in 0 : vector<8x512xf32>, vector<8x512xf32> -> vector<16x512xf32>
    %c0_54 = arith.constant 0 : index
    %c0_55 = arith.constant 0 : index
    %94 = vector.load %arg14[%c0_54, %c0_55] : memref<16x16xbf16, #tpu.memory_space<vmem>>, vector<16x16xbf16>
    %95 = arith.truncf %93 : vector<16x512xf32> to vector<16x512xbf16>
    %cst_56 = arith.constant dense<0.000000e+00> : vector<16x512xf32>
    %96 = tpu.matmul %94, %95, %cst_56 {dimension_numbers = #tpu.dot_dimension_numbers<[1], [0], [0], [1], [0, 0, 1, 1], [], []>} : vector<16x16xbf16>, vector<16x512xbf16>, vector<16x512xf32> -> vector<16x512xf32>
    %97 = vector.extract_strided_slice %96 {offsets = [0, 0], sizes = [8, 512], strides = [1, 1]} : vector<16x512xf32> to vector<8x512xf32>
    %98 = vector.extract_strided_slice %96 {offsets = [8, 0], sizes = [8, 512], strides = [1, 1]} : vector<16x512xf32> to vector<8x512xf32>
    %c4_i32_57 = arith.constant 4 : i32
    %99 = tpu.dynamic_rotate %98 by %c4_i32_57 dim 1 : vector<8x512xf32>, i32 -> vector<8x512xf32>
    %100 = arith.subf %97, %99 : vector<8x512xf32>
    %101 = vector.broadcast %7 : vector<1x512xf32> to vector<8x512xf32>
    %102 = arith.mulf %100, %101 : vector<8x512xf32>
    %103 = arith.addf %99, %102 : vector<8x512xf32>
    %c0_58 = arith.constant 0 : index
    %c0_59 = arith.constant 0 : index
    %104 = vector.load %arg15[%c0_58, %c0_59] : memref<8x1xf32, #tpu.memory_space<vmem>>, vector<8x1xf32>
    %105 = vector.broadcast %104 : vector<8x1xf32> to vector<8x512xf32>
    %106 = arith.addf %103, %105 : vector<8x512xf32>
    %c0_60 = arith.constant 0 : index
    %c0_61 = arith.constant 0 : index
    %107 = vector.load %arg16[%c0_60, %c0_61] : memref<8x1xf32, #tpu.memory_space<vmem>>, vector<8x1xf32>
    %108 = vector.broadcast %107 : vector<8x1xf32> to vector<8x512xf32>
    %109 = arith.mulf %106, %108 : vector<8x512xf32>
    %c0_62 = arith.constant 0 : index
    %c0_63 = arith.constant 0 : index
    %110 = vector.load %arg17[%c0_62, %c0_63] : memref<8x1xf32, #tpu.memory_space<vmem>>, vector<8x1xf32>
    %111 = vector.broadcast %110 : vector<8x1xf32> to vector<8x512xf32>
    %112 = arith.addf %109, %111 : vector<8x512xf32>
    %cst_64 = arith.constant 0.000000e+00 : f32
    %113 = vector.broadcast %cst_64 : f32 to vector<8x512xf32>
    %114 = arith.maximumf %112, %113 : vector<8x512xf32>
    %c508_i32_65 = arith.constant 508 : i32
    %115 = tpu.dynamic_rotate %114 by %c508_i32_65 dim 1 : vector<8x512xf32>, i32 -> vector<8x512xf32>
    %116 = vector.broadcast %3 : vector<1x512xf32> to vector<8x512xf32>
    %117 = arith.mulf %115, %116 : vector<8x512xf32>
    %118 = tpu.concatenate %114, %117 in 0 : vector<8x512xf32>, vector<8x512xf32> -> vector<16x512xf32>
    %c0_66 = arith.constant 0 : index
    %c0_67 = arith.constant 0 : index
    %119 = vector.load %arg18[%c0_66, %c0_67] : memref<16x16xbf16, #tpu.memory_space<vmem>>, vector<16x16xbf16>
    %120 = arith.truncf %118 : vector<16x512xf32> to vector<16x512xbf16>
    %cst_68 = arith.constant dense<0.000000e+00> : vector<16x512xf32>
    %121 = tpu.matmul %119, %120, %cst_68 {dimension_numbers = #tpu.dot_dimension_numbers<[1], [0], [0], [1], [0, 0, 1, 1], [], []>} : vector<16x16xbf16>, vector<16x512xbf16>, vector<16x512xf32> -> vector<16x512xf32>
    %122 = vector.extract_strided_slice %121 {offsets = [0, 0], sizes = [8, 512], strides = [1, 1]} : vector<16x512xf32> to vector<8x512xf32>
    %123 = vector.extract_strided_slice %121 {offsets = [8, 0], sizes = [8, 512], strides = [1, 1]} : vector<16x512xf32> to vector<8x512xf32>
    %c2_i32_69 = arith.constant 2 : i32
    %124 = tpu.dynamic_rotate %123 by %c2_i32_69 dim 1 : vector<8x512xf32>, i32 -> vector<8x512xf32>
    %125 = arith.subf %122, %124 : vector<8x512xf32>
    %126 = vector.broadcast %6 : vector<1x512xf32> to vector<8x512xf32>
    %127 = arith.mulf %125, %126 : vector<8x512xf32>
    %128 = arith.addf %124, %127 : vector<8x512xf32>
    %c0_70 = arith.constant 0 : index
    %c0_71 = arith.constant 0 : index
    %129 = vector.load %arg19[%c0_70, %c0_71] : memref<8x1xf32, #tpu.memory_space<vmem>>, vector<8x1xf32>
    %130 = vector.broadcast %129 : vector<8x1xf32> to vector<8x512xf32>
    %131 = arith.addf %128, %130 : vector<8x512xf32>
    %c0_72 = arith.constant 0 : index
    %c0_73 = arith.constant 0 : index
    %132 = vector.load %arg20[%c0_72, %c0_73] : memref<8x1xf32, #tpu.memory_space<vmem>>, vector<8x1xf32>
    %133 = vector.broadcast %132 : vector<8x1xf32> to vector<8x512xf32>
    %134 = arith.mulf %131, %133 : vector<8x512xf32>
    %c0_74 = arith.constant 0 : index
    %c0_75 = arith.constant 0 : index
    %135 = vector.load %arg21[%c0_74, %c0_75] : memref<8x1xf32, #tpu.memory_space<vmem>>, vector<8x1xf32>
    %136 = vector.broadcast %135 : vector<8x1xf32> to vector<8x512xf32>
    %137 = arith.addf %134, %136 : vector<8x512xf32>
    %cst_76 = arith.constant 0.000000e+00 : f32
    %138 = vector.broadcast %cst_76 : f32 to vector<8x512xf32>
    %139 = arith.maximumf %137, %138 : vector<8x512xf32>
    %c510_i32_77 = arith.constant 510 : i32
    %140 = tpu.dynamic_rotate %139 by %c510_i32_77 dim 1 : vector<8x512xf32>, i32 -> vector<8x512xf32>
    %141 = vector.broadcast %2 : vector<1x512xf32> to vector<8x512xf32>
    %142 = arith.mulf %140, %141 : vector<8x512xf32>
    %143 = tpu.concatenate %139, %142 in 0 : vector<8x512xf32>, vector<8x512xf32> -> vector<16x512xf32>
    %c0_78 = arith.constant 0 : index
    %c0_79 = arith.constant 0 : index
    %144 = vector.load %arg22[%c0_78, %c0_79] : memref<32x16xbf16, #tpu.memory_space<vmem>>, vector<32x16xbf16>
    %145 = arith.truncf %143 : vector<16x512xf32> to vector<16x512xbf16>
    %cst_80 = arith.constant dense<0.000000e+00> : vector<32x512xf32>
    %146 = tpu.matmul %144, %145, %cst_80 {dimension_numbers = #tpu.dot_dimension_numbers<[1], [0], [0], [1], [0, 0, 1, 1], [], []>} : vector<32x16xbf16>, vector<16x512xbf16>, vector<32x512xf32> -> vector<32x512xf32>
    %147 = vector.extract_strided_slice %146 {offsets = [0, 0], sizes = [16, 512], strides = [1, 1]} : vector<32x512xf32> to vector<16x512xf32>
    %148 = vector.extract_strided_slice %146 {offsets = [16, 0], sizes = [16, 512], strides = [1, 1]} : vector<32x512xf32> to vector<16x512xf32>
    %c1_i32_81 = arith.constant 1 : i32
    %149 = tpu.dynamic_rotate %148 by %c1_i32_81 dim 1 : vector<16x512xf32>, i32 -> vector<16x512xf32>
    %150 = arith.subf %147, %149 : vector<16x512xf32>
    %151 = vector.broadcast %5 : vector<1x512xf32> to vector<16x512xf32>
    %152 = arith.mulf %150, %151 : vector<16x512xf32>
    %153 = arith.addf %149, %152 : vector<16x512xf32>
    %c0_82 = arith.constant 0 : index
    %c0_83 = arith.constant 0 : index
    %154 = vector.load %arg23[%c0_82, %c0_83] : memref<16x1xf32, #tpu.memory_space<vmem>>, vector<16x1xf32>
    %155 = vector.broadcast %154 : vector<16x1xf32> to vector<16x512xf32>
    %156 = arith.addf %153, %155 : vector<16x512xf32>
    %c0_84 = arith.constant 0 : index
    %c0_85 = arith.constant 0 : index
    %157 = vector.load %arg24[%c0_84, %c0_85] : memref<16x1xf32, #tpu.memory_space<vmem>>, vector<16x1xf32>
    %158 = vector.broadcast %157 : vector<16x1xf32> to vector<16x512xf32>
    %159 = arith.mulf %156, %158 : vector<16x512xf32>
    %c0_86 = arith.constant 0 : index
    %c0_87 = arith.constant 0 : index
    %160 = vector.load %arg25[%c0_86, %c0_87] : memref<16x1xf32, #tpu.memory_space<vmem>>, vector<16x1xf32>
    %161 = vector.broadcast %160 : vector<16x1xf32> to vector<16x512xf32>
    %162 = arith.addf %159, %161 : vector<16x512xf32>
    %cst_88 = arith.constant 0.000000e+00 : f32
    %163 = vector.broadcast %cst_88 : f32 to vector<16x512xf32>
    %164 = arith.maximumf %162, %163 : vector<16x512xf32>
    %c1_i32_89 = arith.constant 1 : i32
    %165 = tpu.dynamic_rotate %164 by %c1_i32_89 dim 1 : vector<16x512xf32>, i32 -> vector<16x512xf32>
    %166 = vector.broadcast %0 : vector<1x512xf32> to vector<16x512xf32>
    %167 = arith.mulf %165, %166 : vector<16x512xf32>
    %c511_i32_90 = arith.constant 511 : i32
    %168 = tpu.dynamic_rotate %164 by %c511_i32_90 dim 1 : vector<16x512xf32>, i32 -> vector<16x512xf32>
    %169 = vector.broadcast %1 : vector<1x512xf32> to vector<16x512xf32>
    %170 = arith.mulf %168, %169 : vector<16x512xf32>
    %171 = tpu.concatenate %167, %164, %170 in 0 : vector<16x512xf32>, vector<16x512xf32>, vector<16x512xf32> -> vector<48x512xf32>
    %c0_91 = arith.constant 0 : index
    %c0_92 = arith.constant 0 : index
    %172 = vector.load %arg26[%c0_91, %c0_92] : memref<1x48xbf16, #tpu.memory_space<vmem>>, vector<1x48xbf16>
    %173 = arith.truncf %171 : vector<48x512xf32> to vector<48x512xbf16>
    %cst_93 = arith.constant dense<0.000000e+00> : vector<1x512xf32>
    %174 = tpu.matmul %172, %173, %cst_93 {dimension_numbers = #tpu.dot_dimension_numbers<[1], [0], [0], [1], [0, 0, 1, 1], [], []>} : vector<1x48xbf16>, vector<48x512xbf16>, vector<1x512xf32> -> vector<1x512xf32>
    %c0_94 = arith.constant 0 : index
    %c0_95 = arith.constant 0 : index
    %175 = vector.load %arg27[%c0_94, %c0_95] : memref<1x1xf32, #tpu.memory_space<vmem>>, vector<1x1xf32>
    %176 = vector.broadcast %175 : vector<1x1xf32> to vector<1x512xf32>
    %177 = arith.addf %174, %176 : vector<1x512xf32>
    %cst_96 = arith.constant 5.000000e-01 : f32
    %178 = vector.broadcast %cst_96 : f32 to vector<1x512xf32>
    %179 = arith.mulf %178, %177 : vector<1x512xf32>
    %180 = math.tanh %179 : vector<1x512xf32>
    %cst_97 = arith.constant 1.000000e+00 : f32
    %181 = vector.broadcast %cst_97 : f32 to vector<1x512xf32>
    %182 = arith.addf %180, %181 : vector<1x512xf32>
    %cst_98 = arith.constant 5.000000e-01 : f32
    %183 = vector.broadcast %cst_98 : f32 to vector<1x512xf32>
    %184 = arith.mulf %183, %182 : vector<1x512xf32>
    %c0_99 = arith.constant 0 : index
    %c0_100 = arith.constant 0 : index
    %c0_101 = arith.constant 0 : index
    %185 = vector.load %arg36[%c0_99, %c0_100, %c0_101] : memref<1x1x512xf32, #tpu.memory_space<vmem>>, vector<1x1x512xf32>
    %186 = vector.shape_cast %185 : vector<1x1x512xf32> to vector<1x512xf32>
    %187 = vector.shape_cast %184 : vector<1x512xf32> to vector<1x1x512xf32>
    tpu.vector_store %arg36[%c0_99, %c0_100, %c0_101], %187 {strides = array<i32>} : memref<1x1x512xf32, #tpu.memory_space<vmem>>, vector<1x1x512xf32>,
    return
  }
  func.func @transform_0(%arg0: i32) -> (i32, i32, i32) {
    %c0_i32 = arith.constant 0 : i32
    %c0_i32_0 = arith.constant 0 : i32
    %c0_i32_1 = arith.constant 0 : i32
    return %arg0, %c0_i32, %c0_i32_0 : i32, i32, i32
  }
  func.func @transform_1(%arg0: i32) -> (i32, i32, i32) {
    %c0_i32 = arith.constant 0 : i32
    %c0_i32_0 = arith.constant 0 : i32
    %c0_i32_1 = arith.constant 0 : i32
    %c0_i32_2 = arith.constant 0 : i32
    return %c0_i32, %c0_i32_0, %c0_i32_1 : i32, i32, i32
  }
  func.func @transform_2(%arg0: i32) -> (i32, i32) {
    %c0_i32 = arith.constant 0 : i32
    %c0_i32_0 = arith.constant 0 : i32
    %c0_i32_1 = arith.constant 0 : i32
    return %c0_i32, %c0_i32_0 : i32, i32
  }
  func.func @transform_3(%arg0: i32) -> (i32, i32) {
    %c0_i32 = arith.constant 0 : i32
    %c0_i32_0 = arith.constant 0 : i32
    %c0_i32_1 = arith.constant 0 : i32
    return %c0_i32, %c0_i32_0 : i32, i32
  }
  func.func @transform_4(%arg0: i32) -> (i32, i32) {
    %c0_i32 = arith.constant 0 : i32
    %c0_i32_0 = arith.constant 0 : i32
    %c0_i32_1 = arith.constant 0 : i32
    return %c0_i32, %c0_i32_0 : i32, i32
  }
  func.func @transform_5(%arg0: i32) -> (i32, i32) {
    %c0_i32 = arith.constant 0 : i32
    %c0_i32_0 = arith.constant 0 : i32
    %c0_i32_1 = arith.constant 0 : i32
    return %c0_i32, %c0_i32_0 : i32, i32
  }
  func.func @transform_6(%arg0: i32) -> (i32, i32) {
    %c0_i32 = arith.constant 0 : i32
    %c0_i32_0 = arith.constant 0 : i32
    %c0_i32_1 = arith.constant 0 : i32
    return %c0_i32, %c0_i32_0 : i32, i32
  }
  func.func @transform_7(%arg0: i32) -> (i32, i32) {
    %c0_i32 = arith.constant 0 : i32
    %c0_i32_0 = arith.constant 0 : i32
    %c0_i32_1 = arith.constant 0 : i32
    return %c0_i32, %c0_i32_0 : i32, i32
  }
  func.func @transform_8(%arg0: i32) -> (i32, i32) {
    %c0_i32 = arith.constant 0 : i32
    %c0_i32_0 = arith.constant 0 : i32
    %c0_i32_1 = arith.constant 0 : i32
    return %c0_i32, %c0_i32_0 : i32, i32
  }
  func.func @transform_9(%arg0: i32) -> (i32, i32) {
    %c0_i32 = arith.constant 0 : i32
    %c0_i32_0 = arith.constant 0 : i32
    %c0_i32_1 = arith.constant 0 : i32
    return %c0_i32, %c0_i32_0 : i32, i32
  }
  func.func @transform_10(%arg0: i32) -> (i32, i32) {
    %c0_i32 = arith.constant 0 : i32
    %c0_i32_0 = arith.constant 0 : i32
    %c0_i32_1 = arith.constant 0 : i32
    return %c0_i32, %c0_i32_0 : i32, i32
  }
  func.func @transform_11(%arg0: i32) -> (i32, i32) {
    %c0_i32 = arith.constant 0 : i32
    %c0_i32_0 = arith.constant 0 : i32
    %c0_i32_1 = arith.constant 0 : i32
    return %c0_i32, %c0_i32_0 : i32, i32
  }
  func.func @transform_12(%arg0: i32) -> (i32, i32) {
    %c0_i32 = arith.constant 0 : i32
    %c0_i32_0 = arith.constant 0 : i32
    %c0_i32_1 = arith.constant 0 : i32
    return %c0_i32, %c0_i32_0 : i32, i32
  }
  func.func @transform_13(%arg0: i32) -> (i32, i32) {
    %c0_i32 = arith.constant 0 : i32
    %c0_i32_0 = arith.constant 0 : i32
    %c0_i32_1 = arith.constant 0 : i32
    return %c0_i32, %c0_i32_0 : i32, i32
  }
  func.func @transform_14(%arg0: i32) -> (i32, i32) {
    %c0_i32 = arith.constant 0 : i32
    %c0_i32_0 = arith.constant 0 : i32
    %c0_i32_1 = arith.constant 0 : i32
    return %c0_i32, %c0_i32_0 : i32, i32
  }
  func.func @transform_15(%arg0: i32) -> (i32, i32) {
    %c0_i32 = arith.constant 0 : i32
    %c0_i32_0 = arith.constant 0 : i32
    %c0_i32_1 = arith.constant 0 : i32
    return %c0_i32, %c0_i32_0 : i32, i32
  }
  func.func @transform_16(%arg0: i32) -> (i32, i32) {
    %c0_i32 = arith.constant 0 : i32
    %c0_i32_0 = arith.constant 0 : i32
    %c0_i32_1 = arith.constant 0 : i32
    return %c0_i32, %c0_i32_0 : i32, i32
  }
  func.func @transform_17(%arg0: i32) -> (i32, i32) {
    %c0_i32 = arith.constant 0 : i32
    %c0_i32_0 = arith.constant 0 : i32
    %c0_i32_1 = arith.constant 0 : i32
    return %c0_i32, %c0_i32_0 : i32, i32
  }
  func.func @transform_18(%arg0: i32) -> (i32, i32) {
    %c0_i32 = arith.constant 0 : i32
    %c0_i32_0 = arith.constant 0 : i32
    %c0_i32_1 = arith.constant 0 : i32
    return %c0_i32, %c0_i32_0 : i32, i32
  }
  func.func @transform_19(%arg0: i32) -> (i32, i32) {
    %c0_i32 = arith.constant 0 : i32
    %c0_i32_0 = arith.constant 0 : i32
    %c0_i32_1 = arith.constant 0 : i32
    return %c0_i32, %c0_i32_0 : i32, i32
  }
  func.func @transform_20(%arg0: i32) -> (i32, i32) {
    %c0_i32 = arith.constant 0 : i32
    %c0_i32_0 = arith.constant 0 : i32
    %c0_i32_1 = arith.constant 0 : i32
    return %c0_i32, %c0_i32_0 : i32, i32
  }
  func.func @transform_21(%arg0: i32) -> (i32, i32) {
    %c0_i32 = arith.constant 0 : i32
    %c0_i32_0 = arith.constant 0 : i32
    %c0_i32_1 = arith.constant 0 : i32
    return %c0_i32, %c0_i32_0 : i32, i32
  }
  func.func @transform_22(%arg0: i32) -> (i32, i32) {
    %c0_i32 = arith.constant 0 : i32
    %c0_i32_0 = arith.constant 0 : i32
    %c0_i32_1 = arith.constant 0 : i32
    return %c0_i32, %c0_i32_0 : i32, i32
  }
  func.func @transform_23(%arg0: i32) -> (i32, i32) {
    %c0_i32 = arith.constant 0 : i32
    %c0_i32_0 = arith.constant 0 : i32
    %c0_i32_1 = arith.constant 0 : i32
    return %c0_i32, %c0_i32_0 : i32, i32
  }
  func.func @transform_24(%arg0: i32) -> (i32, i32) {
    %c0_i32 = arith.constant 0 : i32
    %c0_i32_0 = arith.constant 0 : i32
    %c0_i32_1 = arith.constant 0 : i32
    return %c0_i32, %c0_i32_0 : i32, i32
  }
  func.func @transform_25(%arg0: i32) -> (i32, i32) {
    %c0_i32 = arith.constant 0 : i32
    %c0_i32_0 = arith.constant 0 : i32
    %c0_i32_1 = arith.constant 0 : i32
    return %c0_i32, %c0_i32_0 : i32, i32
  }
  func.func @transform_26(%arg0: i32) -> (i32, i32) {
    %c0_i32 = arith.constant 0 : i32
    %c0_i32_0 = arith.constant 0 : i32
    %c0_i32_1 = arith.constant 0 : i32
    return %c0_i32, %c0_i32_0 : i32, i32
  }
  func.func @transform_27(%arg0: i32) -> (i32, i32) {
    %c0_i32 = arith.constant 0 : i32
    %c0_i32_0 = arith.constant 0 : i32
    %c0_i32_1 = arith.constant 0 : i32
    return %c0_i32, %c0_i32_0 : i32, i32
  }
  func.func @transform_28(%arg0: i32) -> (i32, i32) {
    %c0_i32 = arith.constant 0 : i32
    %c0_i32_0 = arith.constant 0 : i32
    %c0_i32_1 = arith.constant 0 : i32
    return %c0_i32, %c0_i32_0 : i32, i32
  }
  func.func @transform_29(%arg0: i32) -> (i32, i32) {
    %c0_i32 = arith.constant 0 : i32
    %c0_i32_0 = arith.constant 0 : i32
    %c0_i32_1 = arith.constant 0 : i32
    return %c0_i32, %c0_i32_0 : i32, i32
  }
  func.func @transform_30(%arg0: i32) -> (i32, i32) {
    %c0_i32 = arith.constant 0 : i32
    %c0_i32_0 = arith.constant 0 : i32
    %c0_i32_1 = arith.constant 0 : i32
    return %c0_i32, %c0_i32_0 : i32, i32
  }
  func.func @transform_31(%arg0: i32) -> (i32, i32) {
    %c0_i32 = arith.constant 0 : i32
    %c0_i32_0 = arith.constant 0 : i32
    %c0_i32_1 = arith.constant 0 : i32
    return %c0_i32, %c0_i32_0 : i32, i32
  }
  func.func @transform_32(%arg0: i32) -> (i32, i32) {
    %c0_i32 = arith.constant 0 : i32
    %c0_i32_0 = arith.constant 0 : i32
    %c0_i32_1 = arith.constant 0 : i32
    return %c0_i32, %c0_i32_0 : i32, i32
  }
  func.func @transform_33(%arg0: i32) -> (i32, i32) {
    %c0_i32 = arith.constant 0 : i32
    %c0_i32_0 = arith.constant 0 : i32
    %c0_i32_1 = arith.constant 0 : i32
    return %c0_i32, %c0_i32_0 : i32, i32
  }
  func.func @transform_34(%arg0: i32) -> (i32, i32) {
    %c0_i32 = arith.constant 0 : i32
    %c0_i32_0 = arith.constant 0 : i32
    %c0_i32_1 = arith.constant 0 : i32
    return %c0_i32, %c0_i32_0 : i32, i32
  }
  func.func @transform_35(%arg0: i32) -> (i32, i32, i32) {
    %c0_i32 = arith.constant 0 : i32
    %c0_i32_0 = arith.constant 0 : i32
    %c0_i32_1 = arith.constant 0 : i32
    return %arg0, %c0_i32, %c0_i32_0 : i32, i32, i32
  }
}

</mosaic_0001>

<bundles_post_ra>
// kernel: tpu_custom_call.1
= control target key start
LH: loop header
LB: loop body
LE: loop exit
PB: predicated region body
PF: predicated region fallthrough
CT: control target
= control target key end

     0   :  { %s3052_s6 = smov 1   ;;  %s3053_s10 = smov 2   ;;  %s3992_s0 = inlined_call_operand.smem [shape: u32[36], index: -1, kind: input, shape index: {}] }
   0x1   :  { %s3105_s5 = sld [smem:[%s3992_s0]]   ;;  %s3054_s14 = smov 3  }
   0x2   :  { %s3110_s9 = sld [smem:[%s3992_s0 + %s3052_s6]]   ;;  %s3055_s18 = smov 4  }
   0x3   :  { %s3115_s13 = sld [smem:[%s3992_s0 + %s3053_s10]]   ;;  %s3056_s22 = smov 5  }
   0x4   :  { %s3120_s17 = sld [smem:[%s3992_s0 + %s3054_s14]]   ;;  %s3057_s26 = smov 6  }
   0x5   :  { %s3125_s21 = sld [smem:[%s3992_s0 + %s3055_s18]]   ;;  %s3058_s30 = smov 7  }
   0x6   :  { %s3130_s25 = sld [smem:[%s3992_s0 + %s3056_s22]]   ;;  %s3059_s4 = smov 8  }
   0x7   :  { %4013 = sst [smem:[#allocation6_spill]] %s3105_s5  ;;  %s3060_s10 = smov 9  }
   0x8   :  { %4014 = sst [smem:[#allocation7_spill]] %s3110_s9  ;;  %s3061_s15 = smov 10  }
   0x9   :  { %4015 = sst [smem:[#allocation8_spill]] %s3115_s13  ;;  %s3062_s20 = smov 11  }
   0xa   :  { %s3135_s29 = sld [smem:[%s3992_s0 + %s3057_s26]]   ;;  %s3063_s26 = smov 12  }
   0xb   :  { %s3140_s3 = sld [smem:[%s3992_s0 + %s3058_s30]]   ;;  %s3064_s1 = smov 13  }
   0xc   :  { %s3145_s8 = sld [smem:[%s3992_s0 + %s3059_s4]]   ;;  %s3065_s7 = smov 14  }
   0xd   :  { %s3150_s14 = sld [smem:[%s3992_s0 + %s3060_s10]]   ;;  %s3067_s22 = smov 16  }
   0xe   :  { %s3155_s19 = sld [smem:[%s3992_s0 + %s3061_s15]]   ;;  %s3066_s15 = smov 15  }
   0xf   :  { %s3160_s24 = sld [smem:[%s3992_s0 + %s3062_s20]]   ;;  %s3068_s28 = smov 17  }
  0x10   :  { %s3165_s30 = sld [smem:[%s3992_s0 + %s3063_s26]]   ;;  %s3078_s16 = smov 27  }
  0x11   :  { %4016 = sst [smem:[#allocation9_spill]] %s3140_s3  ;;  %s3079_s23 = smov 28  }
  0x12   :  { %4017 = sst [smem:[#allocation10_spill]] %s3145_s8  ;;  %s3081_s10 = smov 30  }
  0x13   :  { %4018 = sst [smem:[#allocation11_spill]] %s3150_s14 }
  0x14   :  { %s3170_s6 = sld [smem:[%s3992_s0 + %s3064_s1]]   ;;  %s3080_s1 = smov 29  }
  0x15   :  { %s3175_s12 = sld [smem:[%s3992_s0 + %s3065_s7]]   ;;  %s3069_s7 = smov 18  }
  0x16   :  { %4019 = sst [smem:[#allocation12_spill]] %s3165_s30 }
  0x17   :  { %s3180_s20 = sld [smem:[%s3992_s0 + %s3066_s15]]   ;;  %s3070_s15 = smov 19  }
  0x18   :  { %s3185_s27 = sld [smem:[%s3992_s0 + %s3067_s22]]   ;;  %s3071_s22 = smov 20  }
  0x19   :  { %s3190_s4 = sld [smem:[%s3992_s0 + %s3068_s28]]   ;;  %s3072_s28 = smov 21  }
  0x1a   :  { %4020 = sst [smem:[#allocation13_spill]] %s3170_s6 }
  0x1b   :  { %4021 = sst [smem:[#allocation14_spill]] %s3175_s12 }
  0x1c   :  { %s3195_s6 = sld [smem:[%s3992_s0 + %s3069_s7]]   ;;  %s3073_s7 = smov 22  }
  0x1d   :  { %4022 = sst [smem:[#allocation15_spill]] %s3180_s20 }
  0x1e   :  { %4023 = sst [smem:[#allocation16_spill]] %s3185_s27 }
  0x1f   :  { %4024 = sst [smem:[#allocation17_spill]] %s3190_s4 }
  0x20   :  { %s3200_s20 = sld [smem:[%s3992_s0 + %s3070_s15]]   ;;  %s3074_s15 = smov 23  }
  0x21   :  { %s3205_s27 = sld [smem:[%s3992_s0 + %s3071_s22]]   ;;  %s3075_s22 = smov 24  }
  0x22   :  { %4025 = sst [smem:[#allocation18_spill]] %s3195_s6 }
  0x23   :  { %s3210_s4 = sld [smem:[%s3992_s0 + %s3072_s28]]   ;;  %s3076_s28 = smov 25  }
  0x24   :  { %s3215_s6 = sld [smem:[%s3992_s0 + %s3073_s7]]   ;;  %s3077_s7 = smov 26  }
  0x25   :  { %s3253_s12 = sld [smem:[%s3992_s0 + %s3081_s10]]   ;;  %s3085_s10 = smov 34  }
  0x26   :  { %4026 = sst [smem:[#allocation19_spill]] %s3200_s20 }
  0x27   :  { %4027 = sst [smem:[#allocation20_spill]] %s3205_s27 }
  0x28   :  { %s3220_s20 = sld [smem:[%s3992_s0 + %s3074_s15]]   ;;  %s3086_s15 = smov 35  }
  0x29   :  { %4028 = sst [smem:[#allocation21_spill]] %s3210_s4 }
  0x2a   :  { %4029 = sst [smem:[#allocation22_spill]] %s3215_s6 }
  0x2b   :  { %s3225_s27 = sld [smem:[%s3992_s0 + %s3075_s22]]  }
  0x2c   :  { %s3230_s4 = sld [smem:[%s3992_s0 + %s3076_s28]]  }
  0x2d   :  { %s2844_s6 = sld [smem:[%s3992_s0 + %s3077_s7]]  }
  0x2e   :  { %4030 = sst [smem:[#allocation23_spill]] %s3220_s20 }
  0x2f   :  { %s3238_s20 = sld [smem:[%s3992_s0 + %s3078_s16]]   ;;  %s3082_s16 = smov 31  }
  0x30   :  { %4034 = sst [smem:[#allocation27_spill]] %s3253_s12 }
  0x31   :  { %4031 = sst [smem:[#allocation24_spill]] %s3225_s27 }
  0x32   :  { %4032 = sst [smem:[#allocation25_spill]] %s3230_s4 }
  0x33   :  { %s3243_s27 = sld [smem:[%s3992_s0 + %s3079_s23]]   ;;  %s3083_s23 = smov 32   ;;  %v76_v0 = vstv %s2844_s6 }
  0x34   :  { %s3248_s4 = sld [smem:[%s3992_s0 + %s3080_s1]]   ;;  %s3084_s1 = smov 33   ;;  %77 = vst [vmem:[#allocation2] sm:$0x1] %v76_v0 }
  0x35   :  { %s3258_s14 = sld [smem:[%s3992_s0 + %s3082_s16]]  }
  0x36   :  { %s3263_s30 = sld [smem:[%s3992_s0 + %s3083_s23]]  }
  0x37   :  { %s3268_s7 = sld [smem:[%s3992_s0 + %s3084_s1]]  }
  0x38   :  { %s3273_s16 = sld [smem:[%s3992_s0 + %s3085_s10]]  }
  0x39   :  { %s3278_s23 = sld [smem:[%s3992_s0 + %s3086_s15]]  }
  0x3a   :  { %4033 = sst [smem:[#allocation26_spill]] %s3248_s4 }
  0x3b   :  { %4035 = sst [smem:[#allocation28_spill]] %s3258_s14 }
  0x3d   :  { %4036 = sst [smem:[#allocation29_spill]] %s3268_s7 }
  0x3e   :  { %78 = vsyncpa [#allocation4], 0 }
  0x3f   :  { %80 = vsyncpa [#allocation4 + $0x1], 0  ;;  %s3280_s6 = smov 0   ;;  %s3282_s22 = smov 0  }
  0x40   :  { %s3284_s26 = smov 0   ;;  %s3286_s1 = smov 0  }
  0x41 LB: > { %s4037_s13 = sld [smem:[#allocation8_spill]]  ;;  %s4038_s9 = sld [smem:[#allocation7_spill]]  ;;  %s3042_s22 = sphi %s3282_s22, %s4070_s22   ;;  %s3038_s6 = sphi %s3280_s6, %s4069_s6   ;;  %s3050_s1 = sphi %s3286_s1, %s4072_s1   ;;  %s3046_s26 = sphi %s3284_s26, %s4071_s26  }
  0x42   : > { %s3301_s0 = sadd.s32 4294967295, %s3050_s1   ;;  %s2855_s14 = sadd.s32 4294967294, %s3050_s1  }
  0x43   : > { %s3305_s12 = sadd.s32 1, %s3050_s1   ;;  %s833_s28 = sadd.s32 1, %s3046_s26 }
  0x44   : > { %s830_s2 = ssub.s32 %s3050_s1, %s3305_s12  ;;  %p843_p0 = scmp.ne.s32.totalorder %s3046_s26, %s3042_s22 }
  0x45   : > { %p831_p1 = scmp.eq.s32.totalorder %s830_s2, 0  ;;  %p844_p2 = scmp.eq.s32.totalorder %s3301_s0, 3 }
  0x46   : > { %p849_p3 = scmp.ne.s32.totalorder %s3042_s22, %s3038_s6  ;;  %p850_p4 = scmp.eq.s32.totalorder %s2855_s14, 3 }
  0x47   : > { %s3316_s10 = scalar_select %p831_p1, %s3046_s26, %s833_s28  }
  0x48   : > { %p3318_p5 = por %p844_p2, %p843_p0  ;;  %p3322_p6 = por %p850_p4, %p849_p3 }
  0x49   : > { %p2858_p7 = scmp.ge.s32.totalorder %s3050_s1, 1  ;;  %p977_p8 = scmp.lt.s32.totalorder %s3050_s1, 5 }
  0x4b   : > { %p978_p9 = pnand %p2858_p7, %p977_p8 }
  0x4c   : > { %v2861_v1 = vld [vmem:[%s4038_s9 + $0x10] sm:$0xff] (!%p978_p9)  ;;  %v1177_v2 = vld [vmem:[%s4038_s9] sm:$0xff] (!%p978_p9)  ;;  %p1064_p10 = scmp.lt.s32.totalorder (!%p978_p9), %s3301_s0, 3  ;;  %s4041_s5 = sld [smem:[#allocation6_spill]] (!%p978_p9)  ;;  %v1079_v3 = vlaneseq (!%p978_p9)  ;;  %v3087_v4 = vmov (!%p978_p9), 0   ;;  %v2862_v6 = vld [vmem:[%s4038_s9 + $0x18] sm:$0xff] (!%p978_p9) }
  0x4d   : > { %981 = sbr.rel (%p978_p9) target bundleno = 3209 (0xc89), region = 160  ;;  %2975 = vset.pattern.permute.xlu1 (!%p978_p9), %v3087_v4  ;;  %2974 = vset.pattern.permute.xlu0 (!%p978_p9), %v3087_v4  ;;  %v1178_v7 = vld [vmem:[%s4038_s9 + $0x8] sm:$0xff] (!%p978_p9)  ;;  %s3999_s2 = smov (!%p978_p9), 1   ;;  %v2863_v18 = vld [vmem:[%s4038_s9 + $0x20] sm:$0xff] (!%p978_p9)  ;;  %vm1493_vm4 = vcmask (!%p978_p9), 392192   ;;  %vm1693_vm7 = vcmask (!%p978_p9), 1043456  }
  0x4e   : > { %1218 = vperm.xlu1 (!%p978_p9), %2975, %v2861_v1   ;;  %1181 = vperm.xlu0 (!%p978_p9), %2974, %v1177_v2   ;;  %v3335_v5 = vshrl.u32 (!%p978_p9), %v1079_v3, 7  ;;  %v2864_v17 = vld [vmem:[%s4038_s9 + $0x28] sm:$0xff] (!%p978_p9)  ;;  %v1287_v20 = vld [vmem:[%s4037_s13] sm:$0xff] (!%p978_p9)  ;;  %v3395_v29 = vand.u32 (!%p978_p9), 127, %v1079_v3  ;;  %s4042_s3 = sld [smem:[#allocation9_spill]] (!%p978_p9)  ;;  %s4043_s8 = sld [smem:[#allocation10_spill]] (!%p978_p9) }
  0x4f   : > { %1529 = vmatprep.mubr.bf16.mxu0 (!%p978_p9), %v3087_v4  ;;  %1570 = vmatprep.mubr.bf16.mxu1 (!%p978_p9), %v3087_v4  ;;  %v1288_v19 = vld [vmem:[%s4037_s13 + $0x8] sm:$0xff] (!%p978_p9)  ;;  %v1307_v22 = vld [vmem:[%s3120_s17] sm:$0xff] (!%p978_p9)  ;;  %s4044_s4 = sld [smem:[#allocation26_spill]] (!%p978_p9)  ;;  %vm1689_vm8 = vcmask (!%p978_p9), 195584   ;;  %vm1877_vm10 = vcmask (!%p978_p9), 130048   ;;  %s4059_s7 = sld [smem:[#allocation29_spill]] (!%p978_p9) }
  0x50   : > { %v3342_v8 = vsub.s32 (!%p978_p9), 0, %v3335_v5  ;;  %v3345_v9 = vsub.s32 (!%p978_p9), 1, %v3335_v5  ;;  %v3349_v10 = vsub.s32 (!%p978_p9), 3, %v3335_v5  ;;  %v3352_v11 = vsub.s32 (!%p978_p9), 2, %v3335_v5  ;;  %v1308_v21 = vld [vmem:[%s3120_s17 + $0x8] sm:$0xff] (!%p978_p9)  ;;  %v1327_v24 = vld [vmem:[%s3125_s21] sm:$0xff] (!%p978_p9) }
  0x51   : > { %v1328_v23 = vld [vmem:[%s3125_s21 + $0x8] sm:$0xff] (!%p978_p9)  ;;  %v1069_v31 = vld [vmem:[%s3238_s20] sm:$0xf] (!%p978_p9)  ;;  %vm1109_vm0 = vcmp.lt.s32.totalorder (!%p978_p9), %v3395_v29, 1  ;;  %vm1147_vm1 = vcmp.lt.s32.totalorder (!%p978_p9), %v3395_v29, 127  ;;  %vm1403_vm2 = vcmp.lt.s32.totalorder (!%p978_p9), %v3395_v29, 2 }
  0x52   : > { %1223 = vperm.xlu1 (!%p978_p9), %2975, %v2862_v6   ;;  %1186 = vperm.xlu0 (!%p978_p9), %2974, %v1178_v7   ;;  %v3400_v33 = vrot.slane (!%p978_p9), %v1069_v31, %v3342_v8  ;;  %v3403_v34 = vrot.slane (!%p978_p9), %v1069_v31, %v3345_v9  ;;  %v3408_v37 = vrot.slane (!%p978_p9), %v1069_v31, %v3352_v11  ;;  %v1070_v44 = vld [vmem:[%s3243_s27] sm:$0xf] (!%p978_p9)  ;;  %vm1436_vm3 = vcmp.lt.s32.totalorder (!%p978_p9), %v3395_v29, 126 }
  0x53   : > { %v3417_v43 = vrot.slane (!%p978_p9), %v1069_v31, %v3349_v10  ;;  %v3426_v50 = vrot.slane (!%p978_p9), %v1070_v44, %v3342_v8  ;;  %v3429_v51 = vrot.slane (!%p978_p9), %v1070_v44, %v3349_v10  ;;  %v3434_v54 = vrot.slane (!%p978_p9), %v1070_v44, %v3345_v9 }
  0x54   : > { %s1065_s18 = scalar_select %p1064_p10, %s3301_s0, 3  ;;  %v3437_v55 = vrot.slane %v1070_v44, %v3352_v11  ;;  %vm1627_vm5 = vcmp.lt.s32.totalorder %v3395_v29, 4  ;;  %vm1644_vm6 = vcmp.lt.s32.totalorder %v3395_v29, 124  ;;  %vm1836_vm9 = vcmp.lt.s32.totalorder %v3395_v29, 120 }
  0x55   : > { %vm2743_vm11 = vcmp.lt.s32.totalorder %v1079_v3, 512 }
  0x56   : > { %s2860_s14 = sshll.u32 %s1065_s18, 2  ;;  %s3997_s18 = smov 127  }
  0x57   : > { %s1067_s28 = scalar_lea.vmem %s4041_s5, %s2860_s14  ;;  %s4003_s14 = smov 2  }
  0x58   : > { %v1077_v12 = vld [vmem:[%s1067_s28] sm:$0xf]  ;;  %s4001_s28 = smov 126  }
  0x59   : > { %v3355_v13 = vrot.slane %v1077_v12, %v3345_v9  ;;  %v3358_v14 = vrot.slane %v1077_v12, %v3342_v8  ;;  %v3365_v15 = vrot.slane %v1077_v12, %v3349_v10  ;;  %v3368_v16 = vrot.slane %v1077_v12, %v3352_v11 }
  0x5b   : > { %1101 = vrot.lane.b32.xlu1 %v3355_v13, %s3999_s2  ;;  %1099 = vrot.lane.b32.xlu0 %v3358_v14, %s3999_s2 }
  0x5f   : > { %1105 = vrot.lane.b32.xlu1 %v3365_v15, %s3999_s2  ;;  %1103 = vrot.lane.b32.xlu0 %v3368_v16, %s3999_s2  ;;  %s4045_s2 = sld [smem:[#allocation12_spill]] }
  0x63   : > { %1252 = vperm.xlu1 %2975, %v2864_v17   ;;  %1247 = vperm.xlu0 %2974, %v2863_v18  }
  0x67   : > { %1141 = vrot.lane.b32.xlu1 %v3355_v13, %s3997_s18  ;;  %1139 = vrot.lane.b32.xlu0 %v3358_v14, %s3997_s18 }
  0x6b   : > { %1145 = vrot.lane.b32.xlu1 %v3365_v15, %s3997_s18  ;;  %1143 = vrot.lane.b32.xlu0 %v3368_v16, %s3997_s18 }
  0x6f   : > { %1296 = vperm.xlu1 %2975, %v1288_v19   ;;  %1291 = vperm.xlu0 %2974, %v1287_v20  }
  0x73   : > { %1316 = vperm.xlu1 %2975, %v1308_v21   ;;  %1311 = vperm.xlu0 %2974, %v1307_v22  }
  0x77   : > { %1336 = vperm.xlu1 %2975, %v1328_v23   ;;  %1331 = vperm.xlu0 %2974, %v1327_v24  }
  0xcd   : > { %v1219_v25 = vpop.permute.xlu1 %1218  ;;  %v3390_v26 = vpop.permute.xlu0 %1181 }
  0xce   : > { %v1226_v56 = vmul.f32 %v1219_v25, %v3358_v14  ;;  %v1227_v57 = vmul.f32 %v1219_v25, %v3355_v13  ;;  %v1228_v62 = vmul.f32 %v1219_v25, %v3368_v16  ;;  %v1229_v63 = vmul.f32 %v1219_v25, %v3365_v15 }
  0xd1   : > { %v1224_v27 = vpop.permute.xlu1 %1223  ;;  %v3392_v28 = vpop.permute.xlu0 %1186 }
  0xd2   : > { %v1230_v2 = vmul.f32 %v1224_v27, %v3358_v14  ;;  %v1231_v6 = vmul.f32 %v1224_v27, %v3355_v13  ;;  %v1232_v7 = vmul.f32 %v1224_v27, %v3368_v16  ;;  %v1233_v17 = vmul.f32 %v1224_v27, %v3365_v15 }
  0xd5   : > { %v1102_v30 = vpop.permute.xlu1 %1101  ;;  %v1100_v32 = vpop.permute.xlu0 %1099 }
  0xd6   : > { %v1112_v35 = vsel %vm1109_vm0, %v1100_v32, %v1102_v30 }
  0xd7   : > { %v1136_v42 = vmul.f32 %v3403_v34, %v1112_v35 }
  0xd9   : > { %v1106_v36 = vpop.permute.xlu1 %1105  ;;  %v1104_v38 = vpop.permute.xlu0 %1103  ;;  %v1196_v52 = vrot.slane %v1136_v42, %v3342_v8 }
  0xda   : > { %v1113_v39 = vsel %vm1109_vm0, %v1106_v36, %v1100_v32  ;;  %v1111_v40 = vsel %vm1109_vm0, %v1102_v30, %v1104_v38  ;;  %v1110_v46 = vsel %vm1109_vm0, %v1104_v38, %v1106_v36 }
  0xdb   : > { %v1135_v41 = vmul.f32 %v3400_v33, %v1113_v39  ;;  %v1137_v47 = vmul.f32 %v3408_v37, %v1111_v40  ;;  %v1138_v53 = vmul.f32 %v3417_v43, %v1110_v46  ;;  %v1206_v18 = vmul.f32 %v1196_v52, %v3390_v26 }
  0xdc   : > { %v1210_v19 = vmul.f32 %v1196_v52, %v3392_v28 }
  0xdd   : > { %v1192_v45 = vrot.slane %v1135_v41, %v3342_v8  ;;  %v1200_v59 = vrot.slane %v1137_v47, %v3342_v8  ;;  %v1204_v20 = vrot.slane %v1138_v53, %v3342_v8  ;;  %v1235_v36 = vadd.f32 %v1227_v57, %v1206_v18 }
  0xde   : > { %v1239_v52 = vadd.f32 %v1231_v6, %v1210_v19 }
  0xdf   : > { %v1205_v58 = vmul.f32 %v1192_v45, %v3390_v26  ;;  %v1209_v0 = vmul.f32 %v1192_v45, %v3392_v28  ;;  %v1207_v22 = vmul.f32 %v1200_v59, %v3390_v26  ;;  %v1211_v23 = vmul.f32 %v1200_v59, %v3392_v28 }
  0xe0   : > { %v1208_v38 = vmul.f32 %v1204_v20, %v3390_v26  ;;  %v1212_v39 = vmul.f32 %v1204_v20, %v3392_v28 }
  0xe1   : > { %v1234_v21 = vadd.f32 %v1226_v56, %v1205_v58  ;;  %v1238_v16 = vadd.f32 %v1230_v2, %v1209_v0  ;;  %v1236_v53 = vadd.f32 %v1228_v62, %v1207_v22  ;;  %v1240_v56 = vadd.f32 %v1232_v7, %v1211_v23 }
  0xe2   : > { %v1253_v48 = vpop.permute.xlu1 %1252  ;;  %v1248_v49 = vpop.permute.xlu0 %1247  ;;  %v1237_v2 = vadd.f32 %v1229_v63, %v1208_v38 }
  0xe6   : > { %v1142_v60 = vpop.permute.xlu1 %1141  ;;  %v1140_v61 = vpop.permute.xlu0 %1139 }
  0xe7   : > { %v1150_v1 = vsel %vm1147_vm1, %v1140_v61, %v1142_v60 }
  0xe8   : > { %v1173_v12 = vmul.f32 %v3426_v50, %v1150_v1 }
  0xea   : > { %v1258_v14 = vrot.slane %v1173_v12, %v3342_v8  ;;  %v1146_v13 = vpop.permute.xlu1 %1145  ;;  %v1144_v24 = vpop.permute.xlu0 %1143  ;;  %v1241_v12 = vadd.f32 %v1233_v17, %v1212_v39 }
  0xeb   : > { %v1151_v25 = vsel %vm1147_vm1, %v1146_v13, %v1140_v61  ;;  %v1148_v15 = vsel %vm1147_vm1, %v1144_v24, %v1146_v13  ;;  %v1149_v27 = vsel %vm1147_vm1, %v1142_v60, %v1144_v24 }
  0xec   : > { %v1271_v30 = vmul.f32 %v1258_v14, %v1248_v49  ;;  %v1275_v31 = vmul.f32 %v1258_v14, %v1253_v48  ;;  %v1176_v32 = vmul.f32 %v3429_v51, %v1151_v25  ;;  %v1174_v35 = vmul.f32 %v3434_v54, %v1149_v27 }
  0xed   : > { %v1175_v40 = vmul.f32 %v3437_v55, %v1148_v15 }
  0xee   : > { %v1270_v41 = vrot.slane %v1176_v32, %v3342_v8  ;;  %v1262_v42 = vrot.slane %v1174_v35, %v3342_v8  ;;  %v1297_v44 = vpop.permute.xlu1 %1296  ;;  %v1292_v45 = vpop.permute.xlu0 %1291  ;;  %v1283_v46 = vadd.f32 %v1275_v31, %v1238_v16  ;;  %v1279_v47 = vadd.f32 %v1271_v30, %v1234_v21 }
  0xef   : > { %v1266_v58 = vrot.slane %v1175_v40, %v3342_v8 }
  0xf0   : > { %v1274_v57 = vmul.f32 %v1270_v41, %v1248_v49  ;;  %v1278_v59 = vmul.f32 %v1270_v41, %v1253_v48  ;;  %v1272_v26 = vmul.f32 %v1262_v42, %v1248_v49  ;;  %v1276_v60 = vmul.f32 %v1262_v42, %v1253_v48 }
  0xf1   : > { %v1273_v28 = vmul.f32 %v1266_v58, %v1248_v49  ;;  %v1277_v61 = vmul.f32 %v1266_v58, %v1253_v48  ;;  %v1303_v0 = vadd.f32 %v1297_v44, %v1283_v46  ;;  %v1299_v1 = vadd.f32 %v1292_v45, %v1279_v47 }
  0xf2   : > { %v1317_v18 = vpop.permute.xlu1 %1316  ;;  %v1312_v20 = vpop.permute.xlu0 %1311  ;;  %v1284_v14 = vadd.f32 %v1276_v60, %v1239_v52  ;;  %v1280_v13 = vadd.f32 %v1272_v26, %v1235_v36  ;;  %v1286_v19 = vadd.f32 %v1278_v59, %v1241_v12  ;;  %v1282_v22 = vadd.f32 %v1274_v57, %v1237_v2 }
  0xf3   : > { %v1285_v21 = vadd.f32 %v1277_v61, %v1240_v56  ;;  %v1281_v6 = vadd.f32 %v1273_v28, %v1236_v53  ;;  %v1323_v23 = vmul.f32 %v1317_v18, %v1303_v0  ;;  %v1319_v24 = vmul.f32 %v1312_v20, %v1299_v1 }
  0xf4   : > { %v1304_v62 = vadd.f32 %v1297_v44, %v1284_v14  ;;  %v1300_v7 = vadd.f32 %v1292_v45, %v1280_v13  ;;  %v1306_v32 = vadd.f32 %v1297_v44, %v1286_v19  ;;  %v1302_v35 = vadd.f32 %v1292_v45, %v1282_v22 }
  0xf5   : > { %v1305_v16 = vadd.f32 %v1297_v44, %v1285_v21  ;;  %v1301_v25 = vadd.f32 %v1292_v45, %v1281_v6 }
  0xf6   : > { %v1337_v49 = vpop.permute.xlu1 %1336  ;;  %v1332_v48 = vpop.permute.xlu0 %1331  ;;  %v1324_v15 = vmul.f32 %v1317_v18, %v1304_v62  ;;  %v1320_v27 = vmul.f32 %v1312_v20, %v1300_v7  ;;  %v1326_v41 = vmul.f32 %v1317_v18, %v1306_v32  ;;  %v1322_v42 = vmul.f32 %v1312_v20, %v1302_v35  ;;  %v1589_v32 = vld [vmem:[%s4043_s8] sm:$0xff] }
  0xf7   : > { %v1343_v63 = vadd.f32 %v1337_v49, %v1323_v23  ;;  %v1339_v17 = vadd.f32 %v1332_v48, %v1319_v24  ;;  %v1325_v30 = vmul.f32 %v1317_v18, %v1305_v16  ;;  %v1321_v31 = vmul.f32 %v1312_v20, %v1301_v25 }
  0xf8   : > { %v1344_v39 = vadd.f32 %v1337_v49, %v1324_v15  ;;  %v1340_v40 = vadd.f32 %v1332_v48, %v1320_v27  ;;  %v1346_v56 = vadd.f32 %v1337_v49, %v1326_v41  ;;  %v1342_v58 = vadd.f32 %v1332_v48, %v1322_v42 }
  0xf9   : > { %v1351_v36 = vmax.f32 %v1343_v63, 0.0  ;;  %v1347_v38 = vmax.f32 %v1339_v17, 0.0  ;;  %v1345_v52 = vadd.f32 %v1337_v49, %v1325_v30  ;;  %v1341_v53 = vadd.f32 %v1332_v48, %v1321_v31  ;;  %v1579_v30 = vld [vmem:[%s4042_s3] sm:$0xff]  ;;  %s4066_s3 = smov 1  }
  0xfa   : > { %v1352_v46 = vmax.f32 %v1344_v39, 0.0  ;;  %v1348_v47 = vmax.f32 %v1340_v40, 0.0  ;;  %v1354_v57 = vmax.f32 %v1346_v56, 0.0  ;;  %v1350_v59 = vmax.f32 %v1342_v58, 0.0  ;;  %v1487_v31 = vld [vmem:[%s3135_s29] sm:$0xff] }
  0xfb   : > { %1357 = vrot.lane.b32.xlu1 %v1351_v36, %s3997_s18  ;;  %1355 = vrot.lane.b32.xlu0 %v1347_v38, %s3997_s18  ;;  %v1353_v44 = vmax.f32 %v1345_v52, 0.0  ;;  %v1349_v45 = vmax.f32 %v1341_v53, 0.0 }
  0xff   : > { %1361 = vrot.lane.b32.xlu1 %v1352_v46, %s3997_s18  ;;  %1359 = vrot.lane.b32.xlu0 %v1348_v47, %s3997_s18 }
 0x103   : > { %1365 = vrot.lane.b32.xlu1 %v1353_v44, %s3997_s18  ;;  %1363 = vrot.lane.b32.xlu0 %v1349_v45, %s3997_s18 }
 0x107   : > { %1369 = vrot.lane.b32.xlu1 %v1354_v57, %s3997_s18  ;;  %1367 = vrot.lane.b32.xlu0 %v1350_v59, %s3997_s18  ;;  %s4005_s18 = smov 4  }
 0x16d   : > { %v1358_v26 = vpop.permute.xlu1 %1357  ;;  %v1356_v60 = vpop.permute.xlu0 %1355 }
 0x171   : > { %v1362_v28 = vpop.permute.xlu1 %1361  ;;  %v1360_v61 = vpop.permute.xlu0 %1359 }
 0x172   : > { %v1376_v0 = vsel %vm1147_vm1, %v1358_v26, %v1362_v28  ;;  %v1375_v1 = vsel %vm1147_vm1, %v1356_v60, %v1360_v61 }
 0x173   : > { %v3485_v2 = vmax.f32 %v1351_v36, %v1376_v0  ;;  %v3487_v12 = vmax.f32 %v1347_v38, %v1375_v1 }
 0x175   : > { %1389 = vrot.lane.b32.xlu1 %v3485_v2, %s4003_s14  ;;  %v1366_v18 = vpop.permute.xlu1 %1365  ;;  %1387 = vrot.lane.b32.xlu0 %v3487_v12, %s4003_s14  ;;  %v1364_v20 = vpop.permute.xlu0 %1363  ;;  %v1479_v14 = vpack.c.bf16 %v3485_v2, %v3487_v12 }
 0x176   : > { %v1374_v13 = vsel %vm1147_vm1, %v1362_v28, %v1366_v18  ;;  %v1373_v21 = vsel %vm1147_vm1, %v1360_v61, %v1364_v20 }
 0x177   : > { %v3499_v6 = vmax.f32 %v1352_v46, %v1374_v13  ;;  %v3501_v62 = vmax.f32 %v1348_v47, %v1373_v21 }
 0x179   : > { %1393 = vrot.lane.b32.xlu1 %v3499_v6, %s4003_s14  ;;  %v1370_v7 = vpop.permute.xlu1 %1369  ;;  %1391 = vrot.lane.b32.xlu0 %v3501_v62, %s4003_s14  ;;  %v1368_v19 = vpop.permute.xlu0 %1367  ;;  %v1480_v22 = vpack.c.bf16 %v3499_v6, %v3501_v62 }
 0x17a   : > { %v1372_v23 = vsel %vm1147_vm1, %v1366_v18, %v1370_v7  ;;  %v1378_v24 = vsel %vm1147_vm1, %v1370_v7, %v1358_v26  ;;  %v1371_v16 = vsel %vm1147_vm1, %v1364_v20, %v1368_v19  ;;  %v1377_v25 = vsel %vm1147_vm1, %v1368_v19, %v1356_v60 }
 0x17b   : > { %v3517_v49 = vmax.f32 %v1353_v44, %v1372_v23  ;;  %v3519_v48 = vmax.f32 %v1354_v57, %v1378_v24  ;;  %v3521_v15 = vmax.f32 %v1349_v45, %v1371_v16  ;;  %v1382_v27 = vmax.f32 %v1350_v59, %v1377_v25  ;;  %v1071_v24 = vld [vmem:[%s4044_s4] sm:$0xf]  ;;  %s2890_s4 = sshll.u32 %s3301_s0, 6  ;;  %s3096_s0 = smov [#allocation3]  }
 0x17c   : > { %v3582_v16 = vrot.slane %v1071_v24, %v3342_v8  ;;  %s3954_s8 = scalar_lea.hbm %s3278_s23, %s2890_s4 }
 0x17d   : > { %1397 = vrot.lane.b32.xlu1 %v3517_v49, %s4003_s14  ;;  %1395 = vrot.lane.b32.xlu0 %v3521_v15, %s4003_s14  ;;  %v1482_v63 = vpack.c.bf16 %v3519_v48, %v1382_v27  ;;  %v1481_v17 = vpack.c.bf16 %v3517_v49, %v3521_v15 }
 0x181   : > { %1401 = vrot.lane.b32.xlu1 %v3519_v48, %s4003_s14  ;;  %1399 = vrot.lane.b32.xlu0 %v1382_v27, %s4003_s14  ;;  %s4046_s14 = sld [smem:[#allocation27_spill]] }
 0x185   : > { %1422 = vrot.lane.b32.xlu1 %v3485_v2, %s4001_s28  ;;  %1420 = vrot.lane.b32.xlu0 %v3487_v12, %s4001_s28 }
 0x189   : > { %1426 = vrot.lane.b32.xlu1 %v3499_v6, %s4001_s28  ;;  %1424 = vrot.lane.b32.xlu0 %v3501_v62, %s4001_s28  ;;  %v3592_v6 = vrot.slane %v1071_v24, %v3345_v9 }
 0x18d   : > { %1430 = vrot.lane.b32.xlu1 %v3517_v49, %s4001_s28  ;;  %1428 = vrot.lane.b32.xlu0 %v3521_v15, %s4001_s28  ;;  %v3609_v49 = vrot.slane %v1071_v24, %v3349_v10 }
 0x191   : > { %1434 = vrot.lane.b32.xlu1 %v3519_v48, %s4001_s28  ;;  %1432 = vrot.lane.b32.xlu0 %v1382_v27, %s4001_s28 }
 0x195   : > { %1582 = vperm.xlu1 %2975, %v1579_v30   ;;  %1490 = vperm.xlu0 %2974, %v1487_v31  }
 0x199   : > { %1592 = vperm.xlu0 %2974, %v1589_v32  }
 0x1e7   : > { %v1390_v35 = vpop.permute.xlu1 %1389  ;;  %v1388_v36 = vpop.permute.xlu0 %1387 }
 0x1eb   : > { %v1394_v38 = vpop.permute.xlu1 %1393  ;;  %v1392_v39 = vpop.permute.xlu0 %1391 }
 0x1ec   : > { %v1409_v40 = vsel %vm1403_vm2, %v1390_v35, %v1394_v38  ;;  %v1408_v41 = vsel %vm1403_vm2, %v1388_v36, %v1392_v39 }
 0x1ed   : > { %v1413_v42 = vmul.f32 %v1408_v41, %v3403_v34  ;;  %v1417_v46 = vmul.f32 %v1409_v40, %v3403_v34 }
 0x1ef   : > { %v1398_v47 = vpop.permute.xlu1 %1397  ;;  %v1396_v52 = vpop.permute.xlu0 %1395  ;;  %v1476_v53 = vpack.c.bf16 %v1417_v46, %v1413_v42 }
 0x1f0   : > { %v1407_v44 = vsel %vm1403_vm2, %v1394_v38, %v1398_v47  ;;  %v1406_v45 = vsel %vm1403_vm2, %v1392_v39, %v1396_v52 }
 0x1f1   : > { %1497 = vmatprep.subr.bf16.mxu0 %v1476_v53  ;;  %v1418_v56 = vmul.f32 %v1407_v44, %v3408_v37  ;;  %v1414_v58 = vmul.f32 %v1406_v45, %v3408_v37  ;;  %v1474_v44 = vld [vmem:[%s3130_s25] sm:$0xf] }
 0x1f3   : > { %v1402_v57 = vpop.permute.xlu1 %1401  ;;  %v1400_v59 = vpop.permute.xlu0 %1399  ;;  %v1477_v23 = vpack.c.bf16 %v1418_v56, %v1414_v58 }
 0x1f4   : > { %v1405_v26 = vsel %vm1403_vm2, %v1398_v47, %v1402_v57  ;;  %v1411_v60 = vsel %vm1403_vm2, %v1402_v57, %v1390_v35  ;;  %v1404_v28 = vsel %vm1403_vm2, %v1396_v52, %v1400_v59  ;;  %v1410_v61 = vsel %vm1403_vm2, %v1400_v59, %v1388_v36 }
 0x1f5   : > { %v1416_v0 = vmul.f32 %v1411_v60, %v3400_v33  ;;  %v1412_v1 = vmul.f32 %v1410_v61, %v3400_v33  ;;  %v1415_v18 = vmul.f32 %v1404_v28, %v3417_v43  ;;  %v1419_v20 = vmul.f32 %v1405_v26, %v3417_v43 }
 0x1f6   : > { %v3606_v35 = vrot.slane %v1071_v24, %v3352_v11 }
 0x1f7   : > { %v1423_v13 = vpop.permute.xlu1 %1422  ;;  %v1421_v21 = vpop.permute.xlu0 %1420  ;;  %v1475_v7 = vpack.c.bf16 %v1416_v0, %v1412_v1  ;;  %v1478_v19 = vpack.c.bf16 %v1419_v20, %v1415_v18 }
 0x1f9   : > { %1498 = vmatpush1.bf16.msra.mxu0 %v1475_v7  ;;  %1538 = vmatprep.subr.bf16.mxu1 %v1478_v19 }
 0x1fa   : > { %1499 = vmatprep.subr.bf16.mxu0 %v1480_v22  ;;  %1539 = vmatpush1.bf16.msra.mxu1 %v1477_v23 }
 0x1fb   : > { %v1427_v25 = vpop.permute.xlu1 %1426  ;;  %1540 = vmatprep.subr.bf16.mxu1 %v1482_v63  ;;  %v1425_v48 = vpop.permute.xlu0 %1424 }
 0x1fc   : > { %v1442_v27 = vsel %vm1436_vm3, %v1423_v13, %v1427_v25  ;;  %v1441_v30 = vsel %vm1436_vm3, %v1421_v21, %v1425_v48 }
 0x1fd   : > { %1500 = vmatpush1.bf16.msra.mxu0 %v1479_v14  ;;  %v1470_v62 = vmul.f32 %v3582_v16, %v1442_v27  ;;  %v1466_v22 = vmul.f32 %v3582_v16, %v1441_v30 }
 0x1fe   : > { %1541 = vmatpush1.bf16.msra.mxu1 %v1481_v17 }
 0x1ff   : > { %v1431_v63 = vpop.permute.xlu1 %1430  ;;  %v1429_v31 = vpop.permute.xlu0 %1428  ;;  %v1483_v38 = vpack.c.bf16 %v1470_v62, %v1466_v22 }
 0x200   : > { %v1440_v32 = vsel %vm1436_vm3, %v1427_v25, %v1431_v63  ;;  %v1439_v2 = vsel %vm1436_vm3, %v1425_v48, %v1429_v31 }
 0x201   : > { %v1471_v12 = vmul.f32 %v3592_v6, %v1440_v32  ;;  %v1467_v14 = vmul.f32 %v3592_v6, %v1439_v2 }
 0x203   : > { %v1435_v15 = vpop.permute.xlu1 %1434  ;;  %v1433_v17 = vpop.permute.xlu0 %1432  ;;  %v1484_v36 = vpack.c.bf16 %v1471_v12, %v1467_v14 }
 0x204   : > { %v1438_v39 = vsel %vm1436_vm3, %v1431_v63, %v1435_v15  ;;  %v1444_v40 = vsel %vm1436_vm3, %v1435_v15, %v1423_v13  ;;  %v1437_v41 = vsel %vm1436_vm3, %v1429_v31, %v1433_v17  ;;  %v1443_v42 = vsel %vm1436_vm3, %v1433_v17, %v1421_v21 }
 0x205   : > { %v1472_v46 = vmul.f32 %v3606_v35, %v1438_v39  ;;  %v1473_v47 = vmul.f32 %v3609_v49, %v1444_v40  ;;  %v1468_v52 = vmul.f32 %v3606_v35, %v1437_v41  ;;  %v1469_v53 = vmul.f32 %v3609_v49, %v1443_v42  ;;  %1501 = vmatprep.subr.bf16.mxu0 %v1484_v36 }
 0x206   : > { %1502 = vmatpush1.bf16.msra.mxu0 %v1483_v38 }
 0x207   : > { %v1486_v45 = vpack.c.bf16 %v1473_v47, %v1469_v53  ;;  %v1485_v56 = vpack.c.bf16 %v1472_v46, %v1468_v52  ;;  %v1683_v52 = vld [vmem:[%s3155_s19] sm:$0xff] }
 0x208   : > { %v1788_v53 = vld [vmem:[%s3160_s24] sm:$0xff] }
 0x209   : > { %2865 = vmatmul.mubr.msk.bf16.vlgmr.msra.gmra.mrb[0].mxu0 %vm1493_vm4, %v1474_v44  ;;  %1542 = vmatprep.subr.bf16.mxu1 %v1486_v45 }
 0x20a   : > { %1543 = vmatpush1.bf16.msra.mxu1 %v1485_v56  ;;  %1738 = vmatprep.mubr.bf16.mxu0 %v3087_v4 }
 0x20d   : > { %2866 = vmatmul.mubr.msk.bf16.vlgmr.msra.gmra.mrb[0].mxu1 %vm1493_vm4, %v1474_v44  ;;  %v1798_v44 = vld [vmem:[%s4045_s2] sm:$0xff]  ;;  %s4047_s2 = sld [smem:[#allocation11_spill]] }
 0x20e   : > { %1779 = vmatprep.mubr.bf16.mxu1 %v3087_v4 }
 0x214   : > { %v1491_v58 = vpop.permute.xlu0 %1490  ;;  %v1583_v60 = vpop.permute.xlu1 %1582 }
 0x218   : > { %v1593_v18 = vpop.permute.xlu0 %1592 }
 0x2dc   : > { %v1531_v57 = vpop.f32.mrb[0].mxu0 }
 0x2dd   : > { %v1532_v59 = vadd.f32 %v1531_v57, %v1491_v58  ;;  %v1533_v26 = vpop.f32.mrb[1].mxu0 }
 0x2de   : > { %v1534_v28 = vadd.f32 %v1533_v26, %v1491_v58  ;;  %v1535_v61 = vpop.f32.mrb[2].mxu0 }
 0x2df   : > { %v1585_v0 = vmul.f32 %v1583_v60, %v1532_v59  ;;  %v1536_v1 = vpop.f32.mrb[3].mxu0 }
 0x2e0   : > { %v1586_v20 = vmul.f32 %v1583_v60, %v1534_v28  ;;  %v1572_v13 = vpop.f32.mrb[0].mxu1 }
 0x2e1   : > { %v1573_v21 = vadd.f32 %v1572_v13, %v1491_v58  ;;  %v1574_v7 = vpop.f32.mrb[1].mxu1  ;;  %v1595_v19 = vadd.f32 %v1593_v18, %v1585_v0 }
 0x2e2   : > { %v1575_v23 = vadd.f32 %v1574_v7, %v1491_v58  ;;  %v1576_v24 = vpop.f32.mrb[2].mxu1  ;;  %v1596_v25 = vadd.f32 %v1593_v18, %v1586_v20 }
 0x2e3   : > { %v1587_v48 = vmul.f32 %v1583_v60, %v1573_v21  ;;  %v1577_v27 = vpop.f32.mrb[3].mxu1  ;;  %v1599_v30 = vmax.f32 %v1595_v19, 0.0 }
 0x2e4   : > { %v1588_v62 = vmul.f32 %v1583_v60, %v1575_v23  ;;  %v1600_v22 = vmax.f32 %v1596_v25, 0.0  ;;  %v1072_v60 = vld [vmem:[%s4046_s14] sm:$0xf]  ;;  %s4048_s14 = sld [smem:[#allocation14_spill]] }
 0x2e5   : > { %1603 = vrot.lane.b32.xlu1 %v1599_v30, %s4001_s28  ;;  %v1597_v63 = vadd.f32 %v1593_v18, %v1587_v48  ;;  %v3667_v7 = vrot.slane %v1072_v60, %v3342_v8  ;;  %v3670_v19 = vrot.slane %v1072_v60, %v3345_v9 }
 0x2e6   : > { %1605 = vrot.lane.b32.xlu0 %v1600_v22, %s4001_s28  ;;  %v1598_v31 = vadd.f32 %v1593_v18, %v1588_v62  ;;  %v3675_v62 = vrot.slane %v1072_v60, %v3352_v11 }
 0x2e7   : > { %v1601_v32 = vmax.f32 %v1597_v63, 0.0 }
 0x2e8   : > { %v1602_v2 = vmax.f32 %v1598_v31, 0.0  ;;  %v3681_v31 = vrot.slane %v1072_v60, %v3349_v10 }
 0x2e9   : > { %1607 = vrot.lane.b32.xlu1 %v1601_v32, %s4001_s28 }
 0x2ea   : > { %1609 = vrot.lane.b32.xlu0 %v1602_v2, %s4001_s28  ;;  %s4007_s28 = smov 124  }
 0x357   : > { %v1604_v12 = vpop.permute.xlu1 %1603 }
 0x358   : > { %v1606_v14 = vpop.permute.xlu0 %1605 }
 0x359   : > { %v1613_v15 = vsel %vm1436_vm3, %v1604_v12, %v1606_v14 }
 0x35a   : > { %v1615_v17 = vmax.f32 %v1599_v30, %v1613_v15 }
 0x35b   : > { %v1608_v36 = vpop.permute.xlu1 %1607 }
 0x35c   : > { %v1612_v38 = vsel %vm1436_vm3, %v1606_v14, %v1608_v36  ;;  %v1610_v39 = vpop.permute.xlu0 %1609  ;;  %1619 = vrot.lane.b32.xlu1 %v1615_v17, %s4005_s18 }
 0x35d   : > { %v1616_v40 = vmax.f32 %v1600_v22, %v1612_v38  ;;  %v1611_v41 = vsel %vm1436_vm3, %v1608_v36, %v1610_v39  ;;  %v1614_v42 = vsel %vm1436_vm3, %v1610_v39, %v1604_v12 }
 0x35e   : > { %v1617_v46 = vmax.f32 %v1601_v32, %v1611_v41  ;;  %v1618_v47 = vmax.f32 %v1602_v2, %v1614_v42  ;;  %v1674_v42 = vld [vmem:[%s4047_s2] sm:$0xf]  ;;  %s4049_s2 = sld [smem:[#allocation28_spill]] }
 0x35f   : > { %1621 = vrot.lane.b32.xlu0 %v1616_v40, %s4005_s18 }
 0x360   : > { %1623 = vrot.lane.b32.xlu1 %v1617_v46, %s4005_s18 }
 0x363   : > { %1625 = vrot.lane.b32.xlu0 %v1618_v47, %s4005_s18  ;;  %s3094_s18 = smov 120  }
 0x364   : > { %1636 = vrot.lane.b32.xlu1 %v1615_v17, %s4007_s28 }
 0x367   : > { %1638 = vrot.lane.b32.xlu0 %v1616_v40, %s4007_s28 }
 0x368   : > { %1640 = vrot.lane.b32.xlu1 %v1617_v46, %s4007_s28 }
 0x36b   : > { %1642 = vrot.lane.b32.xlu0 %v1618_v47, %s4007_s28 }
 0x36c   : > { %1686 = vperm.xlu1 %2975, %v1683_v52  }
 0x36f   : > { %1791 = vperm.xlu0 %2974, %v1788_v53  }
 0x370   : > { %1801 = vperm.xlu1 %2975, %v1798_v44  }
 0x3ce   : > { %v1620_v45 = vpop.permute.xlu1 %1619 }
 0x3d1   : > { %v1622_v56 = vpop.permute.xlu0 %1621 }
 0x3d2   : > { %v1630_v58 = vsel %vm1627_vm5, %v1620_v45, %v1622_v56  ;;  %v1624_v57 = vpop.permute.xlu1 %1623 }
 0x3d3   : > { %v1633_v59 = vmul.f32 %v1630_v58, %v3403_v34  ;;  %v1629_v26 = vsel %vm1627_vm5, %v1622_v56, %v1624_v57 }
 0x3d4   : > { %v1634_v0 = vmul.f32 %v1629_v26, %v3408_v37 }
 0x3d5   : > { %v1626_v28 = vpop.permute.xlu0 %1625  ;;  %v1676_v61 = vpack.c.bf16 %v1616_v40, %v1633_v59 }
 0x3d6   : > { %v1628_v1 = vsel %vm1627_vm5, %v1624_v57, %v1626_v28  ;;  %v1631_v18 = vsel %vm1627_vm5, %v1626_v28, %v1620_v45  ;;  %v1637_v20 = vpop.permute.xlu1 %1636  ;;  %v1677_v48 = vpack.c.bf16 %v1617_v46, %v1634_v0 }
 0x3d7   : > { %v1632_v13 = vmul.f32 %v1631_v18, %v3400_v33  ;;  %v1635_v21 = vmul.f32 %v1628_v1, %v3417_v43  ;;  %1706 = vmatprep.subr.bf16.mxu0 %v1676_v61 }
 0x3d9   : > { %v1675_v23 = vpack.c.bf16 %v1615_v17, %v1632_v13  ;;  %v1639_v24 = vpop.permute.xlu0 %1638  ;;  %v1678_v25 = vpack.c.bf16 %v1618_v47, %v1635_v21 }
 0x3da   : > { %v1647_v27 = vsel %vm1644_vm6, %v1637_v20, %v1639_v24  ;;  %v1641_v30 = vpop.permute.xlu1 %1640 }
 0x3db   : > { %v1670_v22 = vmul.f32 %v3667_v7, %v1647_v27  ;;  %v1646_v63 = vsel %vm1644_vm6, %v1639_v24, %v1641_v30  ;;  %1707 = vmatpush1.bf16.msra.mxu0 %v1675_v23  ;;  %1747 = vmatprep.subr.bf16.mxu1 %v1678_v25 }
 0x3dc   : > { %v1671_v32 = vmul.f32 %v3670_v19, %v1646_v63  ;;  %1748 = vmatpush1.bf16.msra.mxu1 %v1677_v48 }
 0x3dd   : > { %v1679_v2 = vpack.c.bf16 %v1670_v22, %v1670_v22  ;;  %v1643_v12 = vpop.permute.xlu0 %1642 }
 0x3de   : > { %v1680_v14 = vpack.c.bf16 %v1671_v32, %v1671_v32  ;;  %v1645_v15 = vsel %vm1644_vm6, %v1641_v30, %v1643_v12  ;;  %v1648_v17 = vsel %vm1644_vm6, %v1643_v12, %v1637_v20 }
 0x3df   : > { %v1672_v36 = vmul.f32 %v3675_v62, %v1645_v15  ;;  %v1673_v38 = vmul.f32 %v3681_v31, %v1648_v17  ;;  %v1695_v39 = vsel %vm1693_vm7, %v1679_v2, 0 }
 0x3e0   : > { %2867 = vmatprep.subr.msk.bf16.mxu0 %vm1693_vm7, %v1680_v14 }
 0x3e1   : > { %v1681_v40 = vpack.c.bf16 %v1672_v36, %v1672_v36  ;;  %v1682_v41 = vpack.c.bf16 %v1673_v38, %v1673_v38  ;;  %1709 = vmatpush1.bf16.msra.mxu0 %v1695_v39 }
 0x3e3   : > { %2869 = vmatprep.subr.msk.bf16.mxu1 %vm1693_vm7, %v1682_v41  ;;  %v1701_v46 = vsel %vm1693_vm7, %v1681_v40, 0 }
 0x3e4   : > { %2868 = vmatmul.mubr.msk.bf16.vlgmr.msra.gmra.mrb[4].mxu0 %vm1689_vm8, %v1674_v42  ;;  %1750 = vmatpush1.bf16.msra.mxu1 %v1701_v46  ;;  %v2012_v46 = vld [vmem:[%s4048_s14] sm:$0xff]  ;;  %s4052_s14 = sld [smem:[#allocation15_spill]] }
 0x3e5   : > { %1913 = vmatprep.mubr.bf16.mxu0 %v3087_v4 }
 0x3e7   : > { %2870 = vmatmul.mubr.msk.bf16.vlgmr.msra.gmra.mrb[4].mxu1 %vm1689_vm8, %v1674_v42 }
 0x3e8   : > { %1956 = vmatprep.mubr.bf16.mxu1 %v3087_v4 }
 0x3eb   : > { %v1687_v47 = vpop.permute.xlu1 %1686 }
 0x3ee   : > { %v1792_v45 = vpop.permute.xlu0 %1791 }
 0x3ef   : > { %v1802_v60 = vpop.permute.xlu1 %1801 }
 0x4b7   : > { %v1740_v52 = vpop.f32.mrb[4].mxu0 }
 0x4b8   : > { %v1741_v53 = vadd.f32 %v1740_v52, %v1687_v47  ;;  %v1742_v44 = vpop.f32.mrb[5].mxu0 }
 0x4b9   : > { %v1743_v56 = vadd.f32 %v1742_v44, %v1687_v47  ;;  %v1744_v58 = vpop.f32.mrb[6].mxu0 }
 0x4ba   : > { %v1794_v57 = vmul.f32 %v1792_v45, %v1741_v53  ;;  %v1745_v59 = vpop.f32.mrb[7].mxu0  ;;  %v1781_v26 = vpop.f32.mrb[4].mxu1 }
 0x4bb   : > { %v1795_v28 = vmul.f32 %v1792_v45, %v1743_v56  ;;  %v1782_v61 = vadd.f32 %v1781_v26, %v1687_v47  ;;  %v1783_v0 = vpop.f32.mrb[5].mxu1 }
 0x4bc   : > { %v1784_v1 = vadd.f32 %v1783_v0, %v1687_v47  ;;  %v1785_v18 = vpop.f32.mrb[6].mxu1  ;;  %v1804_v20 = vadd.f32 %v1802_v60, %v1794_v57  ;;  %v1073_v47 = vld [vmem:[%s4049_s2] sm:$0xf]  ;;  %s4054_s2 = sld [smem:[#allocation18_spill]] }
 0x4bd   : > { %v1796_v13 = vmul.f32 %v1792_v45, %v1782_v61  ;;  %v1786_v21 = vpop.f32.mrb[7].mxu1  ;;  %v1805_v23 = vadd.f32 %v1802_v60, %v1795_v28  ;;  %v1845_v53 = vrot.slane %v1073_v47, %v3342_v8  ;;  %v1849_v44 = vrot.slane %v1073_v47, %v3345_v9 }
 0x4be   : > { %v1797_v24 = vmul.f32 %v1792_v45, %v1784_v1  ;;  %v1808_v25 = vmax.f32 %v1804_v20, 0.0  ;;  %v1853_v26 = vrot.slane %v1073_v47, %v3352_v11 }
 0x4bf   : > { %v1809_v48 = vmax.f32 %v1805_v23, 0.0  ;;  %v1806_v27 = vadd.f32 %v1802_v60, %v1796_v13 }
 0x4c0   : > { %1812 = vrot.lane.b32.xlu0 %v1808_v25, %s4007_s28  ;;  %v1807_v30 = vadd.f32 %v1802_v60, %v1797_v24  ;;  %v1857_v60 = vrot.slane %v1073_v47, %v3349_v10 }
 0x4c1   : > { %1814 = vrot.lane.b32.xlu1 %v1809_v48, %s4007_s28  ;;  %v1810_v22 = vmax.f32 %v1806_v27, 0.0 }
 0x4c2   : > { %v1811_v63 = vmax.f32 %v1807_v30, 0.0 }
 0x4c4   : > { %1816 = vrot.lane.b32.xlu0 %v1810_v22, %s4007_s28 }
 0x4c5   : > { %1818 = vrot.lane.b32.xlu1 %v1811_v63, %s4007_s28  ;;  %s4050_s28 = sld [smem:[#allocation13_spill]] }
 0x4cb   : > { %v2976_v23 = vld [vmem:[%s4050_s28] sm:$0xff]   ;;  %s4053_s28 = smov 4  }
 0x532   : > { %v1813_v32 = vpop.permute.xlu0 %1812 }
 0x533   : > { %v1815_v2 = vpop.permute.xlu1 %1814 }
 0x534   : > { %v1822_v12 = vsel %vm1644_vm6, %v1813_v32, %v1815_v2 }
 0x535   : > { %v1824_v14 = vmax.f32 %v1808_v25, %v1822_v12 }
 0x536   : > { %v1817_v15 = vpop.permute.xlu0 %1816 }
 0x537   : > { %v1821_v17 = vsel %vm1644_vm6, %v1815_v2, %v1817_v15  ;;  %v1819_v36 = vpop.permute.xlu1 %1818  ;;  %1828 = vrot.lane.b32.xlu0 %v1824_v14, %s3094_s18 }
 0x538   : > { %v1825_v38 = vmax.f32 %v1809_v48, %v1821_v17  ;;  %v1820_v39 = vsel %vm1644_vm6, %v1817_v15, %v1819_v36  ;;  %v1823_v40 = vsel %vm1644_vm6, %v1819_v36, %v1813_v32  ;;  %v2022_v15 = vld [vmem:[%s4052_s14] sm:$0xff]  ;;  %s4056_s14 = sld [smem:[#allocation17_spill]] }
 0x539   : > { %v1826_v41 = vmax.f32 %v1810_v22, %v1820_v39  ;;  %v1827_v42 = vmax.f32 %v1811_v63, %v1823_v40  ;;  %v1076_v40 = vld [vmem:[%s3273_s16] sm:$0xf] }
 0x53a   : > { %1830 = vrot.lane.b32.xlu1 %v1825_v38, %s3094_s18 }
 0x53b   : > { %1832 = vrot.lane.b32.xlu0 %v1826_v41, %s3094_s18 }
 0x53e   : > { %1834 = vrot.lane.b32.xlu1 %v1827_v42, %s3094_s18  ;;  %s4051_s18 = sld [smem:[#allocation16_spill]] }
 0x53f   : > { %2015 = vperm.xlu0 %2974, %v2012_v46  }
 0x5a9   : > { %v1829_v52 = vpop.permute.xlu0 %1828 }
 0x5ac   : > { %v1831_v45 = vpop.permute.xlu1 %1830 }
 0x5ad   : > { %v1839_v56 = vsel %vm1836_vm9, %v1829_v52, %v1831_v45  ;;  %v1833_v58 = vpop.permute.xlu0 %1832 }
 0x5ae   : > { %v1862_v57 = vmul.f32 %v1845_v53, %v1839_v56  ;;  %v1838_v59 = vsel %vm1836_vm9, %v1831_v45, %v1833_v58  ;;  %v1991_v53 = vrot.slane %v1076_v40, %v3345_v9  ;;  %v1987_v45 = vrot.slane %v1076_v40, %v3342_v8 }
 0x5af   : > { %v1863_v28 = vmul.f32 %v1849_v44, %v1838_v59  ;;  %v1995_v44 = vrot.slane %v1076_v40, %v3352_v11  ;;  %v1999_v56 = vrot.slane %v1076_v40, %v3349_v10 }
 0x5b0   : > { %v1835_v61 = vpop.permute.xlu1 %1834  ;;  %v1868_v20 = vpack.c.bf16 %v1862_v57, %v1824_v14  ;;  %v2032_v14 = vld [vmem:[%s4051_s18] sm:$0xff]  ;;  %s4055_s18 = smov 124  }
 0x5b1   : > { %v1837_v0 = vsel %vm1836_vm9, %v1833_v58, %v1835_v61  ;;  %v1840_v1 = vsel %vm1836_vm9, %v1835_v61, %v1829_v52  ;;  %v1869_v18 = vpack.c.bf16 %v1863_v28, %v1825_v38 }
 0x5b2   : > { %v1864_v13 = vmul.f32 %v1853_v26, %v1837_v0  ;;  %v1865_v21 = vmul.f32 %v1857_v60, %v1840_v1 }
 0x5b3   : > { %1881 = vmatprep.subr.bf16.mxu0 %v1869_v18 }
 0x5b4   : > { %v1870_v24 = vpack.c.bf16 %v1864_v13, %v1826_v41  ;;  %1882 = vmatpush1.bf16.msra.mxu0 %v1868_v20  ;;  %v1871_v25 = vpack.c.bf16 %v1865_v21, %v1827_v42 }
 0x5b6   : > { %1924 = vmatprep.subr.bf16.mxu1 %v1871_v25 }
 0x5b7   : > { %2872 = vmatmul.mubr.msk.bf16.vlgmr.msra.gmra.mrb[8].mxu0 %vm1877_vm10, %v2976_v23  ;;  %1925 = vmatpush1.bf16.msra.mxu1 %v1870_v24 }
 0x5b8   : > { %2108 = vmatprep.mubr.bf16.mxu0 %v3087_v4 }
 0x5ba   : > { %2873 = vmatmul.mubr.msk.bf16.vlgmr.msra.gmra.mrb[8].mxu1 %vm1877_vm10, %v2976_v23 }
 0x5bb   : > { %2151 = vmatprep.mubr.bf16.mxu1 %v3087_v4 }
 0x5be   : > { %v2016_v17 = vpop.permute.xlu0 %2015 }
 0x68a   : > { %v1915_v48 = vpop.f32.mrb[8].mxu0 }
 0x68b   : > { %v1917_v27 = vpop.f32.mrb[9].mxu0 }
 0x68c   : > { %v1919_v30 = vpop.f32.mrb[10].mxu0 }
 0x68d   : > { %1967 = vrot.lane.b32.xlu0 %v1919_v30, %s4053_s28  ;;  %v1921_v22 = vpop.f32.mrb[11].mxu0  ;;  %v1958_v63 = vpop.f32.mrb[8].mxu1 }
 0x68e   : > { %1969 = vrot.lane.b32.xlu1 %v1921_v22, %s4053_s28  ;;  %v1960_v32 = vpop.f32.mrb[9].mxu1 }
 0x68f   : > { %v1962_v2 = vpop.f32.mrb[10].mxu1 }
 0x690   : > { %v1964_v12 = vpop.f32.mrb[11].mxu1 }
 0x691   : > { %1971 = vrot.lane.b32.xlu0 %v1962_v2, %s4053_s28 }
 0x692   : > { %1973 = vrot.lane.b32.xlu1 %v1964_v12, %s4053_s28  ;;  %s4057_s28 = sld [smem:[#allocation20_spill]] }
 0x695   : > { %2035 = vperm.xlu0 %2974, %v2032_v14  }
 0x696   : > { %2025 = vperm.xlu1 %2975, %v2022_v15  }
 0x6ff   : > { %v1968_v36 = vpop.permute.xlu0 %1967 }
 0x700   : > { %v1970_v38 = vpop.permute.xlu1 %1969 }
 0x701   : > { %v1977_v42 = vsel %vm1627_vm5, %v1968_v36, %v1970_v38 }
 0x702   : > { %v1980_v58 = vsub.f32 %v1917_v27, %v1977_v42 }
 0x703   : > { %v1972_v39 = vpop.permute.xlu0 %1971 }
 0x704   : > { %v1974_v41 = vpop.permute.xlu1 %1973  ;;  %v1976_v46 = vsel %vm1627_vm5, %v1970_v38, %v1972_v39  ;;  %v2005_v60 = vmul.f32 %v1991_v53, %v1980_v58 }
 0x705   : > { %v1975_v47 = vsel %vm1627_vm5, %v1972_v39, %v1974_v41  ;;  %v1978_v52 = vsel %vm1627_vm5, %v1974_v41, %v1968_v36  ;;  %v1981_v57 = vsub.f32 %v1958_v63, %v1976_v46 }
 0x706   : > { %v1979_v59 = vsub.f32 %v1915_v48, %v1978_v52  ;;  %v1982_v26 = vsub.f32 %v1960_v32, %v1975_v47  ;;  %v2009_v1 = vadd.f32 %v2005_v60, %v1977_v42 }
 0x707   : > { %v2006_v28 = vmul.f32 %v1995_v44, %v1981_v57 }
 0x708   : > { %v2004_v61 = vmul.f32 %v1987_v45, %v1979_v59  ;;  %v2007_v0 = vmul.f32 %v1999_v56, %v1982_v26  ;;  %v2019_v21 = vadd.f32 %v2016_v17, %v2009_v1 }
 0x709   : > { %v2010_v18 = vadd.f32 %v2006_v28, %v1976_v46 }
 0x70a   : > { %v2008_v20 = vadd.f32 %v2004_v61, %v1978_v52  ;;  %v2011_v13 = vadd.f32 %v2007_v0, %v1975_v47 }
 0x70b   : > { %v2020_v23 = vadd.f32 %v2016_v17, %v2010_v18 }
 0x70c   : > { %v2018_v24 = vadd.f32 %v2016_v17, %v2008_v20  ;;  %v2021_v25 = vadd.f32 %v2016_v17, %v2011_v13  ;;  %v2207_v17 = vld [vmem:[%s4054_s2] sm:$0xff]  ;;  %s4058_s2 = sld [smem:[#allocation19_spill]] }
 0x714   : > { %v2036_v48 = vpop.permute.xlu0 %2035 }
 0x715   : > { %v2026_v30 = vpop.permute.xlu1 %2025 }
 0x716   : > { %v2028_v22 = vmul.f32 %v2026_v30, %v2018_v24  ;;  %v2029_v2 = vmul.f32 %v2026_v30, %v2019_v21  ;;  %v2030_v27 = vmul.f32 %v2026_v30, %v2020_v23  ;;  %v2031_v63 = vmul.f32 %v2026_v30, %v2021_v25  ;;  %v2227_v21 = vld [vmem:[%s4057_s28] sm:$0xff]  ;;  %s4062_s28 = sld [smem:[#allocation23_spill]] }
 0x717   : > { %v2217_v23 = vld [vmem:[%s4058_s2] sm:$0xff]  ;;  %s4063_s2 = smov 126  }
 0x718   : > { %v2039_v32 = vadd.f32 %v2036_v48, %v2029_v2  ;;  %v2038_v12 = vadd.f32 %v2036_v48, %v2028_v22  ;;  %v2041_v36 = vadd.f32 %v2036_v48, %v2031_v63  ;;  %v2040_v38 = vadd.f32 %v2036_v48, %v2030_v27  ;;  %v1075_v2 = vld [vmem:[%s4059_s7] sm:$0xf] }
 0x71a   : > { %v2043_v14 = vmax.f32 %v2039_v32, 0.0  ;;  %v2042_v15 = vmax.f32 %v2038_v12, 0.0  ;;  %v2045_v39 = vmax.f32 %v2041_v36, 0.0  ;;  %v2044_v40 = vmax.f32 %v2040_v38, 0.0 }
 0x71b   : > { %v2182_v36 = vrot.slane %v1075_v2, %v3342_v8  ;;  %v2194_v38 = vrot.slane %v1075_v2, %v3349_v10 }
 0x71c   : > { %2048 = vrot.lane.b32.xlu0 %v2043_v14, %s4055_s18  ;;  %2046 = vrot.lane.b32.xlu1 %v2042_v15, %s4055_s18 }
 0x720   : > { %2052 = vrot.lane.b32.xlu0 %v2045_v39, %s4055_s18  ;;  %2050 = vrot.lane.b32.xlu1 %v2044_v40, %s4055_s18  ;;  %s4060_s18 = smov 2  }
 0x724   : > { %2210 = vperm.xlu1 %2975, %v2207_v17  }
 0x78e   : > { %v2049_v41 = vpop.permute.xlu0 %2048  ;;  %v2047_v42 = vpop.permute.xlu1 %2046 }
 0x78f   : > { %v2056_v46 = vsel %vm1644_vm6, %v2047_v42, %v2049_v41 }
 0x790   : > { %v2058_v53 = vmul.f32 %v2056_v46, %v3667_v7  ;;  %v2977_v7 = vld [vmem:[%s4056_s14] sm:$0xff]   ;;  %s4061_s14 = sld [smem:[#allocation22_spill]] }
 0x792   : > { %v2053_v47 = vpop.permute.xlu0 %2052  ;;  %v2051_v52 = vpop.permute.xlu1 %2050  ;;  %v2064_v61 = vpack.c.bf16 %v2058_v53, %v2042_v15  ;;  %v2190_v15 = vrot.slane %v1075_v2, %v3352_v11 }
 0x793   : > { %v2057_v44 = vsel %vm1644_vm6, %v2053_v47, %v2047_v42  ;;  %v2054_v45 = vsel %vm1644_vm6, %v2051_v52, %v2053_v47  ;;  %v2055_v56 = vsel %vm1644_vm6, %v2049_v41, %v2051_v52 }
 0x794   : > { %v2061_v58 = vmul.f32 %v2057_v44, %v3681_v31  ;;  %v2059_v57 = vmul.f32 %v2055_v56, %v3670_v19  ;;  %v2060_v59 = vmul.f32 %v2054_v45, %v3675_v62 }
 0x796   : > { %v2066_v26 = vpack.c.bf16 %v2060_v59, %v2044_v40  ;;  %v2065_v60 = vpack.c.bf16 %v2059_v57, %v2043_v14  ;;  %v2067_v28 = vpack.c.bf16 %v2061_v58, %v2045_v39  ;;  %v2186_v14 = vrot.slane %v1075_v2, %v3345_v9 }
 0x798   : > { %2076 = vmatprep.subr.bf16.mxu0 %v2065_v60  ;;  %2119 = vmatprep.subr.bf16.mxu1 %v2067_v28 }
 0x799   : > { %2077 = vmatpush1.bf16.msra.mxu0 %v2064_v61  ;;  %2120 = vmatpush1.bf16.msra.mxu1 %v2066_v26 }
 0x79c   : > { %2875 = vmatmul.mubr.msk.bf16.vlgmr.msra.gmra.mrb[12].mxu0 %vm1877_vm10, %v2977_v7  ;;  %2876 = vmatmul.mubr.msk.bf16.vlgmr.msra.gmra.mrb[12].mxu1 %vm1877_vm10, %v2977_v7 }
 0x79d   : > { %2313 = vmatprep.mubr.bf16.mxu0 %v3087_v4  ;;  %2366 = vmatprep.mubr.bf16.mxu1 %v3087_v4 }
 0x7a3   : > { %v2211_v24 = vpop.permute.xlu1 %2210 }
 0x86f   : > { %v2110_v19 = vpop.f32.mrb[12].mxu0  ;;  %v2153_v62 = vpop.f32.mrb[12].mxu1 }
 0x870   : > { %v2112_v31 = vpop.f32.mrb[13].mxu0  ;;  %v2155_v0 = vpop.f32.mrb[13].mxu1 }
 0x871   : > { %v2114_v1 = vpop.f32.mrb[14].mxu0  ;;  %v2157_v18 = vpop.f32.mrb[14].mxu1 }
 0x872   : > { %2162 = vrot.lane.b32.xlu1 %v2114_v1, %s4060_s18  ;;  %v2116_v20 = vpop.f32.mrb[15].mxu0  ;;  %v2159_v13 = vpop.f32.mrb[15].mxu1 }
 0x873   : > { %2164 = vrot.lane.b32.xlu0 %v2116_v20, %s4060_s18 }
 0x876   : > { %2166 = vrot.lane.b32.xlu1 %v2157_v18, %s4060_s18 }
 0x877   : > { %2168 = vrot.lane.b32.xlu0 %v2159_v13, %s4060_s18  ;;  %s4064_s18 = sld [smem:[#allocation21_spill]] }
 0x87a   : > { %2230 = vperm.xlu1 %2975, %v2227_v21  }
 0x87b   : > { %2220 = vperm.xlu0 %2974, %v2217_v23  }
 0x8e4   : > { %v2163_v25 = vpop.permute.xlu1 %2162 }
 0x8e5   : > { %v2165_v30 = vpop.permute.xlu0 %2164 }
 0x8e6   : > { %v2172_v63 = vsel %vm1403_vm2, %v2163_v25, %v2165_v30 }
 0x8e7   : > { %v2175_v39 = vsub.f32 %v2112_v31, %v2172_v63 }
 0x8e8   : > { %v2167_v22 = vpop.permute.xlu1 %2166 }
 0x8e9   : > { %v2169_v27 = vpop.permute.xlu0 %2168  ;;  %v2171_v48 = vsel %vm1403_vm2, %v2165_v30, %v2167_v22  ;;  %v2200_v42 = vmul.f32 %v2186_v14, %v2175_v39  ;;  %v2477_v30 = vld [vmem:[%s4062_s28 + $0x8] sm:$0xff] }
 0x8ea   : > { %v2170_v32 = vsel %vm1403_vm2, %v2167_v22, %v2169_v27  ;;  %v2173_v12 = vsel %vm1403_vm2, %v2169_v27, %v2163_v25  ;;  %v2176_v40 = vsub.f32 %v2153_v62, %v2171_v48  ;;  %v2456_v25 = vld [vmem:[%s4061_s14] sm:$0xff] }
 0x8eb   : > { %v2174_v17 = vsub.f32 %v2110_v19, %v2173_v12  ;;  %v2177_v41 = vsub.f32 %v2155_v0, %v2170_v32  ;;  %v2204_v53 = vadd.f32 %v2200_v42, %v2172_v63  ;;  %v2476_v22 = vld [vmem:[%s4062_s28] sm:$0xff] }
 0x8ec   : > { %v2201_v46 = vmul.f32 %v2190_v15, %v2176_v40 }
 0x8ed   : > { %v2199_v47 = vmul.f32 %v2182_v36, %v2174_v17  ;;  %v2202_v52 = vmul.f32 %v2194_v38, %v2177_v41  ;;  %v2214_v58 = vadd.f32 %v2211_v24, %v2204_v53 }
 0x8ee   : > { %v2205_v44 = vadd.f32 %v2201_v46, %v2171_v48  ;;  %v2978_v46 = vld [vmem:[%s4064_s18] sm:$0xff]  }
 0x8ef   : > { %v2203_v45 = vadd.f32 %v2199_v47, %v2173_v12  ;;  %v2206_v56 = vadd.f32 %v2202_v52, %v2170_v32 }
 0x8f0   : > { %v2215_v57 = vadd.f32 %v2211_v24, %v2205_v44 }
 0x8f1   : > { %v2213_v59 = vadd.f32 %v2211_v24, %v2203_v45  ;;  %v2216_v26 = vadd.f32 %v2211_v24, %v2206_v56  ;;  %v2457_v24 = vld [vmem:[%s4061_s14 + $0x8] sm:$0xff] }
 0x8f9   : > { %v2231_v62 = vpop.permute.xlu1 %2230 }
 0x8fa   : > { %v2221_v60 = vpop.permute.xlu0 %2220 }
 0x8fb   : > { %v2223_v28 = vmul.f32 %v2221_v60, %v2213_v59  ;;  %v2224_v61 = vmul.f32 %v2221_v60, %v2214_v58  ;;  %v2225_v7 = vmul.f32 %v2221_v60, %v2215_v57  ;;  %v2226_v19 = vmul.f32 %v2221_v60, %v2216_v26 }
 0x8fd   : > { %v2234_v31 = vadd.f32 %v2231_v62, %v2224_v61  ;;  %v2233_v0 = vadd.f32 %v2231_v62, %v2223_v28  ;;  %v2236_v20 = vadd.f32 %v2231_v62, %v2226_v19  ;;  %v2235_v13 = vadd.f32 %v2231_v62, %v2225_v7 }
 0x8ff   : > { %v2238_v1 = vmax.f32 %v2234_v31, 0.0  ;;  %v2237_v18 = vmax.f32 %v2233_v0, 0.0  ;;  %v2240_v21 = vmax.f32 %v2236_v20, 0.0  ;;  %v2239_v23 = vmax.f32 %v2235_v13, 0.0 }
 0x901   : > { %2243 = vrot.lane.b32.xlu1 %v2238_v1, %s4063_s2  ;;  %2241 = vrot.lane.b32.xlu0 %v2237_v18, %s4063_s2 }
 0x905   : > { %2247 = vrot.lane.b32.xlu1 %v2240_v21, %s4063_s2  ;;  %2245 = vrot.lane.b32.xlu0 %v2239_v23, %s4063_s2  ;;  %s4065_s2 = sld [smem:[#allocation24_spill]] }
 0x909   : > { %2465 = vperm.xlu1 %2975, %v2457_v24   ;;  %2460 = vperm.xlu0 %2974, %v2456_v25   ;;  %v1074_v24 = vld [vmem:[%s3263_s30] sm:$0xf] }
 0x90b   : > { %v2496_v7 = vld [vmem:[%s4065_s2] sm:$0xff]  ;;  %v2497_v19 = vld [vmem:[%s4065_s2 + $0x8] sm:$0xff]  ;;  %s4067_s2 = smov 127  }
 0x90d   : > { %2485 = vperm.xlu1 %2975, %v2477_v30   ;;  %2480 = vperm.xlu0 %2974, %v2476_v22  }
 0x973   : > { %v2244_v2 = vpop.permute.xlu1 %2243  ;;  %v2242_v27 = vpop.permute.xlu0 %2241 }
 0x974   : > { %v2251_v63 = vsel %vm1436_vm3, %v2242_v27, %v2244_v2 }
 0x975   : > { %v2253_v12 = vmul.f32 %v2251_v63, %v3582_v16  ;;  %v2427_v63 = vrot.slane %v1074_v24, %v3345_v9 }
 0x977   : > { %v2248_v48 = vpop.permute.xlu1 %2247  ;;  %v2246_v32 = vpop.permute.xlu0 %2245  ;;  %v2261_v16 = vpack.c.bf16 %v2253_v12, %v2237_v18 }
 0x978   : > { %v2252_v14 = vsel %vm1436_vm3, %v2248_v48, %v2242_v27  ;;  %v2249_v15 = vsel %vm1436_vm3, %v2246_v32, %v2248_v48  ;;  %v2250_v36 = vsel %vm1436_vm3, %v2244_v2, %v2246_v32  ;;  %v2431_v48 = vrot.slane %v1074_v24, %v3352_v11 }
 0x979   : > { %v2256_v38 = vmul.f32 %v2252_v14, %v3609_v49  ;;  %v2254_v39 = vmul.f32 %v2250_v36, %v3592_v6  ;;  %v2255_v40 = vmul.f32 %v2249_v15, %v3606_v35  ;;  %v2979_v6 = vld [vmem:[%s4064_s18 + $0x8] sm:$0xff]   ;;  %v2423_v15 = vrot.slane %v1074_v24, %v3342_v8 }
 0x97a   : > { %v2435_v36 = vrot.slane %v1074_v24, %v3349_v10 }
 0x97b   : > { %v2263_v17 = vpack.c.bf16 %v2255_v40, %v2239_v23  ;;  %v2262_v41 = vpack.c.bf16 %v2254_v39, %v2238_v1  ;;  %v2264_v42 = vpack.c.bf16 %v2256_v38, %v2240_v21 }
 0x97d   : > { %2281 = vmatprep.subr.bf16.mxu0 %v2262_v41  ;;  %2334 = vmatprep.subr.bf16.mxu1 %v2264_v42 }
 0x97e   : > { %2282 = vmatpush1.bf16.msra.mxu0 %v2261_v16  ;;  %2335 = vmatpush1.bf16.msra.mxu1 %v2263_v17 }
 0x981   : > { %2879 = vmatmul.mubr.msk.bf16.vlgmr.msra.gmra.mrb[16].mxu0 %vm1877_vm10, %v2978_v46  ;;  %2881 = vmatmul.mubr.msk.bf16.vlgmr.msra.gmra.mrb[16].mxu1 %vm1877_vm10, %v2978_v46 }
 0x982   : > { %2323 = vmatprep.mubr.bf16.mxu0 %v3087_v4  ;;  %2376 = vmatprep.mubr.bf16.mxu1 %v3087_v4 }
 0x988   : > { %v2461_v62 = vpop.permute.xlu0 %2460  ;;  %v2466_v31 = vpop.permute.xlu1 %2465 }
 0x989   : > { %2880 = vmatmul.mubr.msk.bf16.gmra.mrb[20].mxu0 %vm1877_vm10, %v2979_v6  ;;  %2882 = vmatmul.mubr.msk.bf16.gmra.mrb[20].mxu1 %vm1877_vm10, %v2979_v6 }
 0x98a   : > { %2646 = vmatprep.mubr.bf16.mxu0 %v3087_v4  ;;  %2687 = vmatprep.mubr.bf16.mxu1 %v3087_v4 }
 0x98c   : > { %v2481_v0 = vpop.permute.xlu0 %2480  ;;  %v3823_v1 = vpop.permute.xlu1 %2485 }
 0xa54   : > { %v2315_v35 = vpop.f32.mrb[16].mxu0  ;;  %v2368_v49 = vpop.f32.mrb[16].mxu1 }
 0xa55   : > { %v2317_v47 = vpop.f32.mrb[17].mxu0  ;;  %v2370_v52 = vpop.f32.mrb[17].mxu1 }
 0xa56   : > { %v3811_v53 = vpop.f32.mrb[18].mxu0  ;;  %v2372_v44 = vpop.f32.mrb[18].mxu1 }
 0xa57   : > { %v2321_v45 = vpop.f32.mrb[19].mxu0  ;;  %v2374_v56 = vpop.f32.mrb[19].mxu1 }
 0xa5c   : > { %v2325_v58 = vpop.f32.mrb[20].mxu0  ;;  %v2378_v57 = vpop.f32.mrb[20].mxu1 }
 0xa5d   : > { %2387 = vrot.lane.b32.xlu0 %v2325_v58, %s4066_s3  ;;  %v2327_v59 = vpop.f32.mrb[21].mxu0  ;;  %v2380_v26 = vpop.f32.mrb[21].mxu1 }
 0xa5e   : > { %v2329_v60 = vpop.f32.mrb[22].mxu0  ;;  %v2382_v28 = vpop.f32.mrb[22].mxu1 }
 0xa5f   : > { %2389 = vrot.lane.b32.xlu1 %v2329_v60, %s4066_s3  ;;  %v2331_v4 = vpop.f32.mrb[23].mxu0  ;;  %v2384_v61 = vpop.f32.mrb[23].mxu1 }
 0xa61   : > { %2395 = vrot.lane.b32.xlu0 %v2378_v57, %s4066_s3 }
 0xa63   : > { %2397 = vrot.lane.b32.xlu1 %v2382_v28, %s4066_s3 }
 0xa65   : > { %2391 = vrot.lane.b32.xlu0 %v2327_v59, %s4066_s3 }
 0xa67   : > { %2393 = vrot.lane.b32.xlu1 %v2331_v4, %s4066_s3 }
 0xa69   : > { %2399 = vrot.lane.b32.xlu0 %v2380_v26, %s4066_s3 }
 0xa6b   : > { %2401 = vrot.lane.b32.xlu1 %v2384_v61, %s4066_s3 }
 0xa6d   : > { %2500 = vperm.xlu0 %2974, %v2496_v7  }
 0xa6f   : > { %2505 = vperm.xlu1 %2975, %v2497_v19  }
 0xacf   : > { %v2388_v18 = vpop.permute.xlu0 %2387 }
 0xad1   : > { %v2390_v20 = vpop.permute.xlu1 %2389 }
 0xad3   : > { %v2396_v13 = vpop.permute.xlu0 %2395 }
 0xad5   : > { %v2398_v21 = vpop.permute.xlu1 %2397 }
 0xad7   : > { %v2392_v23 = vpop.permute.xlu0 %2391 }
 0xad8   : > { %v2405_v25 = vsel %vm1109_vm0, %v2392_v23, %v2396_v13  ;;  %v2407_v30 = vsel %vm1109_vm0, %v2388_v18, %v2392_v23 }
 0xad9   : > { %v2394_v22 = vpop.permute.xlu1 %2393  ;;  %v2412_v32 = vsub.f32 %v2317_v47, %v2407_v30  ;;  %v2413_v12 = vsub.f32 %v2368_v49, %v2405_v25 }
 0xada   : > { %v2406_v2 = vsel %vm1109_vm0, %v2394_v22, %v2398_v21  ;;  %v2408_v27 = vsel %vm1109_vm0, %v2390_v20, %v2394_v22 }
 0xadb   : > { %v2400_v14 = vpop.permute.xlu0 %2399  ;;  %v2416_v40 = vsub.f32 %v2321_v45, %v2408_v27  ;;  %v2417_v17 = vsub.f32 %v2372_v44, %v2406_v2  ;;  %v2441_v46 = vmul.f32 %v2427_v63, %v2412_v32  ;;  %v2442_v6 = vmul.f32 %v2431_v48, %v2413_v12 }
 0xadc   : > { %v2403_v38 = vsel %vm1109_vm0, %v2396_v13, %v2400_v14  ;;  %v2409_v39 = vsel %vm1109_vm0, %v2400_v14, %v2388_v18 }
 0xadd   : > { %v2402_v41 = vpop.permute.xlu1 %2401  ;;  %v2411_v42 = vsub.f32 %v2315_v35, %v2409_v39  ;;  %v2414_v9 = vsub.f32 %v2370_v52, %v2403_v38  ;;  %v2445_v57 = vmul.f32 %v2427_v63, %v2416_v40  ;;  %v2446_v59 = vmul.f32 %v2431_v48, %v2417_v17 }
 0xade   : > { %v2404_v11 = vsel %vm1109_vm0, %v2398_v21, %v2402_v41  ;;  %v2410_v16 = vsel %vm1109_vm0, %v2402_v41, %v2390_v20  ;;  %v2449_v26 = vadd.f32 %v2441_v46, %v2407_v30  ;;  %v2450_v35 = vadd.f32 %v2442_v6, %v2405_v25 }
 0xadf   : > { %v2440_v10 = vmul.f32 %v2423_v15, %v2411_v42  ;;  %v2443_v49 = vmul.f32 %v2435_v36, %v2414_v9  ;;  %v2415_v47 = vsub.f32 %v3811_v53, %v2410_v16  ;;  %v2418_v58 = vsub.f32 %v2374_v56, %v2404_v11 }
 0xae0   : > { %v2453_v28 = vadd.f32 %v2445_v57, %v2408_v27  ;;  %v2454_v4 = vadd.f32 %v2446_v59, %v2406_v2  ;;  %v2469_v19 = vadd.f32 %v2461_v62, %v2449_v26  ;;  %v2470_v18 = vadd.f32 %v2461_v62, %v2450_v35 }
 0xae1   : > { %v2444_v45 = vmul.f32 %v2423_v15, %v2415_v47  ;;  %v2447_v44 = vmul.f32 %v2435_v36, %v2418_v58  ;;  %v2448_v52 = vadd.f32 %v2440_v10, %v2409_v39  ;;  %v2451_v60 = vadd.f32 %v2443_v49, %v2403_v38  ;;  %v2601_v47 = vld [vmem:[#allocation2] sm:$0x1] }
 0xae2   : > { %v2473_v21 = vadd.f32 %v2466_v31, %v2453_v28  ;;  %v2474_v23 = vadd.f32 %v2466_v31, %v2454_v4  ;;  %v2489_v24 = vmul.f32 %v2481_v0, %v2469_v19  ;;  %v2490_v22 = vmul.f32 %v2481_v0, %v2470_v18 }
 0xae3   : > { %v2452_v61 = vadd.f32 %v2444_v45, %v2410_v16  ;;  %v2455_v7 = vadd.f32 %v2447_v44, %v2404_v11  ;;  %v2468_v20 = vadd.f32 %v2461_v62, %v2448_v52  ;;  %v2471_v13 = vadd.f32 %v2461_v62, %v2451_v60 }
 0xae4   : > { %v2493_v2 = vmul.f32 %v3823_v1, %v2473_v21  ;;  %v2494_v14 = vmul.f32 %v3823_v1, %v2474_v23 }
 0xae5   : > { %v2472_v53 = vadd.f32 %v2466_v31, %v2452_v61  ;;  %v2475_v56 = vadd.f32 %v2466_v31, %v2455_v7  ;;  %v2488_v63 = vmul.f32 %v2481_v0, %v2468_v20  ;;  %v2491_v48 = vmul.f32 %v2481_v0, %v2471_v13 }
 0xae7   : > { %v2492_v15 = vmul.f32 %v3823_v1, %v2472_v53  ;;  %v2495_v62 = vmul.f32 %v3823_v1, %v2475_v56 }
 0xaec   : > { %v2501_v30 = vpop.permute.xlu0 %2500 }
 0xaed   : > { %v2508_v25 = vadd.f32 %v2501_v30, %v2488_v63  ;;  %v2509_v32 = vadd.f32 %v2501_v30, %v2489_v24  ;;  %v2510_v12 = vadd.f32 %v2501_v30, %v2490_v22  ;;  %v2511_v27 = vadd.f32 %v2501_v30, %v2491_v48 }
 0xaee   : > { %v2506_v36 = vpop.permute.xlu1 %2505 }
 0xaef   : > { %v3851_v38 = vmax.f32 %v2508_v25, 0.0  ;;  %v2512_v31 = vadd.f32 %v2506_v36, %v2492_v15  ;;  %v2513_v39 = vadd.f32 %v2506_v36, %v2493_v2  ;;  %v2514_v40 = vadd.f32 %v2506_v36, %v2494_v14 }
 0xaf0   : > { %v2515_v0 = vadd.f32 %v2506_v36, %v2495_v62  ;;  %v3853_v17 = vmax.f32 %v2509_v32, 0.0  ;;  %v3855_v41 = vmax.f32 %v2510_v12, 0.0  ;;  %v3857_v42 = vmax.f32 %v2511_v27, 0.0 }
 0xaf1   : > { %2524 = vrot.lane.b32.xlu0 %v3851_v38, %s4066_s3  ;;  %v3861_v9 = vmax.f32 %v2512_v31, 0.0  ;;  %v2521_v11 = vmax.f32 %v2513_v39, 0.0  ;;  %v3863_v1 = vmax.f32 %v2514_v40, 0.0 }
 0xaf2   : > { %v2523_v16 = vmax.f32 %v2515_v0, 0.0 }
 0xaf3   : > { %2526 = vrot.lane.b32.xlu1 %v3861_v9, %s4066_s3  ;;  %v2594_v46 = vpack.c.bf16 %v2521_v11, %v3853_v17  ;;  %v2593_v10 = vpack.c.bf16 %v3861_v9, %v3851_v38  ;;  %v2595_v49 = vpack.c.bf16 %v3863_v1, %v3855_v41 }
 0xaf4   : > { %v2596_v6 = vpack.c.bf16 %v2523_v16, %v3857_v42 }
 0xaf5   : > { %2528 = vrot.lane.b32.xlu0 %v3853_v17, %s4066_s3 }
 0xaf7   : > { %2530 = vrot.lane.b32.xlu1 %v2521_v11, %s4066_s3 }
 0xaf9   : > { %2532 = vrot.lane.b32.xlu0 %v3855_v41, %s4066_s3 }
 0xafb   : > { %2534 = vrot.lane.b32.xlu1 %v3863_v1, %s4066_s3 }
 0xafd   : > { %2536 = vrot.lane.b32.xlu0 %v3857_v42, %s4066_s3 }
 0xaff   : > { %2538 = vrot.lane.b32.xlu1 %v2523_v16, %s4066_s3  ;;  %s4068_s3 = sld [smem:[#allocation25_spill]] }
 0xb01   : > { %2556 = vrot.lane.b32.xlu0 %v3851_v38, %s4067_s2 }
 0xb03   : > { %2558 = vrot.lane.b32.xlu1 %v3861_v9, %s4067_s2 }
 0xb05   : > { %2560 = vrot.lane.b32.xlu0 %v3853_v17, %s4067_s2 }
 0xb07   : > { %2562 = vrot.lane.b32.xlu1 %v2521_v11, %s4067_s2 }
 0xb09   : > { %2564 = vrot.lane.b32.xlu0 %v3855_v41, %s4067_s2 }
 0xb0b   : > { %2566 = vrot.lane.b32.xlu1 %v3863_v1, %s4067_s2 }
 0xb0d   : > { %2568 = vrot.lane.b32.xlu0 %v3857_v42, %s4067_s2 }
 0xb0f   : > { %2570 = vrot.lane.b32.xlu1 %v2523_v16, %s4067_s2  ;;  %s1061_s2 = sand.u32 1, %s3042_s22  }
 0xb10   : > { %s2747_s9 = scalar_lea.sflag [#allocation4], %s1061_s2 }
 0xb11   : > { %2604 = vperm.xlu0 %2974, %v2601_v47  }
 0xb63   : > { %v2525_v58 = vpop.permute.xlu0 %2524 }
 0xb65   : > { %v2527_v57 = vpop.permute.xlu1 %2526 }
 0xb67   : > { %v2529_v59 = vpop.permute.xlu0 %2528 }
 0xb68   : > { %v2544_v45 = vsel %vm1109_vm0, %v2525_v58, %v2529_v59 }
 0xb69   : > { %v2531_v44 = vpop.permute.xlu1 %2530  ;;  %v2549_v52 = vmul.f32 %v2544_v45, %v3403_v34 }
 0xb6a   : > { %v2545_v26 = vsel %vm1109_vm0, %v2527_v57, %v2531_v44 }
 0xb6b   : > { %v2533_v35 = vpop.permute.xlu0 %2532  ;;  %v2553_v60 = vmul.f32 %v2545_v26, %v3403_v34 }
 0xb6c   : > { %v2542_v20 = vsel %vm1109_vm0, %v2529_v59, %v2533_v35 }
 0xb6d   : > { %v2535_v28 = vpop.permute.xlu1 %2534  ;;  %v2590_v4 = vpack.c.bf16 %v2553_v60, %v2549_v52  ;;  %v2550_v48 = vmul.f32 %v2542_v20, %v3408_v37 }
 0xb6e   : > { %v2543_v7 = vsel %vm1109_vm0, %v2531_v44, %v2535_v28 }
 0xb6f   : > { %v2537_v61 = vpop.permute.xlu0 %2536  ;;  %2614 = vmatprep.subr.bf16.mxu0 %v2590_v4  ;;  %v2554_v21 = vmul.f32 %v2543_v7, %v3408_v37 }
 0xb70   : > { %v2540_v19 = vsel %vm1109_vm0, %v2533_v35, %v2537_v61  ;;  %v2546_v18 = vsel %vm1109_vm0, %v2537_v61, %v2525_v58 }
 0xb71   : > { %v2539_v13 = vpop.permute.xlu1 %2538  ;;  %v2548_v56 = vmul.f32 %v2546_v18, %v3400_v33  ;;  %v2551_v24 = vmul.f32 %v2540_v19, %v3417_v43  ;;  %v2591_v12 = vpack.c.bf16 %v2554_v21, %v2550_v48  ;;  %v3095_v18 = vmov 1966171168  }
 0xb72   : > { %v2541_v34 = vsel %vm1109_vm0, %v2535_v28, %v2539_v13  ;;  %v2547_v23 = vsel %vm1109_vm0, %v2539_v13, %v2527_v57  ;;  %v2719_v20 = vunpack.c.l.s4 %v3095_v18 }
 0xb73   : > { %v2557_v53 = vpop.permute.xlu0 %2556  ;;  %v2552_v22 = vmul.f32 %v2547_v23, %v3400_v33  ;;  %v2555_v63 = vmul.f32 %v2541_v34, %v3417_v43 }
 0xb75   : > { %v2589_v30 = vpack.c.bf16 %v2552_v22, %v2548_v56  ;;  %v2559_v25 = vpop.permute.xlu1 %2558  ;;  %v2592_v32 = vpack.c.bf16 %v2555_v63, %v2551_v24  ;;  %v2720_v24 = vunpack.c.0.s8 %v2719_v20 }
 0xb77   : > { %v2561_v27 = vpop.permute.xlu0 %2560  ;;  %2615 = vmatpush1.bf16.msra.mxu0 %v2589_v30  ;;  %2655 = vmatprep.subr.bf16.mxu1 %v2592_v32  ;;  %v2723_v32 = vsub.s32 %v2720_v24, %v3335_v5 }
 0xb78   : > { %2616 = vmatprep.subr.bf16.mxu0 %v2594_v46  ;;  %2656 = vmatpush1.bf16.msra.mxu1 %v2591_v12  ;;  %v2576_v37 = vsel %vm1147_vm1, %v2557_v53, %v2561_v27 }
 0xb79   : > { %v2563_v2 = vpop.permute.xlu1 %2562  ;;  %2657 = vmatprep.subr.bf16.mxu1 %v2596_v6  ;;  %v2580_v40 = vmul.f32 %v2576_v37, %v3426_v50  ;;  %v2588_v6 = vld [vmem:[%s4068_s3] sm:$0x1]  ;;  %s2859_s3 = sshll.u32 %s1061_s2, 2 }
 0xb7a   : > { %v2577_v15 = vsel %vm1147_vm1, %v2559_v25, %v2563_v2  ;;  %s1063_s5 = scalar_lea.vmem [#allocation3], %s2859_s3  ;;  %s2992_s3 = sshll.u32 %s3096_s0, 4  ;;  %s2993_s3 = int_to_ptr.vmem [resolvable:$false] %s2992_s3 }
 0xb7b   : > { %v2565_v14 = vpop.permute.xlu0 %2564  ;;  %2617 = vmatpush1.bf16.msra.mxu0 %v2593_v10  ;;  %v2584_v62 = vmul.f32 %v2577_v15, %v3426_v50  ;;  %s2761_s7 = sshll.u32 %s1063_s5, 4  ;;  %s2994_s14 = scalar_lea.vmem %s2993_s3, 128  ;;  %s3956_s7 = int_to_ptr.vmem [resolvable:$true] %s2761_s7 }
 0xb7c   : > { %v2574_v33 = vsel %vm1147_vm1, %v2561_v27, %v2565_v14  ;;  %2658 = vmatpush1.bf16.msra.mxu1 %v2595_v49  ;;  %s2988_s13 = scalar_lea.vmem %s3956_s7, 64  ;;  %p2995_p0 = scmp.lt.s32.totalorder %s3956_s7, %s2993_s3 }
 0xb7d   : > { %v2567_v43 = vpop.permute.xlu1 %2566  ;;  %v2581_v31 = vmul.f32 %v2574_v33, %v3434_v54  ;;  %v2597_v9 = vpack.c.bf16 %v2584_v62, %v2580_v40  ;;  %p2989_p11 = scmp.ne.s32.totalorder %s3956_s7, %s2988_s13  ;;  %p2996_p1 = scmp.lt.s32.totalorder %s2994_s14, %s2988_s13 }
 0xb7e   : > { %v2575_v36 = vsel %vm1147_vm1, %v2563_v2, %v2567_v43 }
 0xb7f   : > { %v2569_v38 = vpop.permute.xlu0 %2568  ;;  %v2585_v39 = vmul.f32 %v2575_v36, %v3434_v54  ;;  %p2990_p12 = pnand %p2989_p11, %p3318_p5  ;;  %p2997_p2 = por %p2996_p1, %p2995_p0 }
 0xb80   : > { %v2572_v0 = vsel %vm1147_vm1, %v2565_v14, %v2569_v38  ;;  %v2578_v17 = vsel %vm1147_vm1, %v2569_v38, %v2557_v53 }
 0xb81   : > { %v2571_v41 = vpop.permute.xlu1 %2570  ;;  %v2598_v42 = vpack.c.bf16 %v2585_v39, %v2581_v31  ;;  %v2582_v16 = vmul.f32 %v2572_v0, %v3437_v55  ;;  %v2583_v54 = vmul.f32 %v2578_v17, %v3429_v51  ;;  %p2991_p13 = pneg %p2990_p12 }
 0xb82   : > { %v2573_v11 = vsel %vm1147_vm1, %v2567_v43, %v2571_v41  ;;  %v2579_v1 = vsel %vm1147_vm1, %v2571_v41, %v2559_v25 }
 0xb83   : > { %v2586_v50 = vmul.f32 %v2573_v11, %v3437_v55  ;;  %v2587_v46 = vmul.f32 %v2579_v1, %v3429_v51  ;;  %2618 = vmatprep.subr.bf16.mxu0 %v2598_v42  ;;  %p2998_p3 = pnand %p2997_p2, %p2991_p13 }
 0xb84   : > { %2619 = vmatpush1.bf16.msra.mxu0 %v2597_v9 }
 0xb85   : > { %v2599_v10 = vpack.c.bf16 %v2586_v50, %v2582_v16  ;;  %v2600_v49 = vpack.c.bf16 %v2587_v46, %v2583_v54 }
 0xb87   : > { %2883 = vmatmul.mubr.msk.bf16.vlgmr.msra.gmra.mrb[24].mxu0 %vm1493_vm4, %v2588_v6  ;;  %2659 = vmatprep.subr.bf16.mxu1 %v2600_v49 }
 0xb88   : > { %2660 = vmatpush1.bf16.msra.mxu1 %v2599_v10 }
 0xb8b   : > { %2884 = vmatmul.mubr.msk.bf16.vlgmr.msra.gmra.mrb[24].mxu1 %vm1493_vm4, %v2588_v6 }
 0xb90   : > { %v2605_v29 = vpop.permute.xlu0 %2604 }
 0xb91   : > { %v2610_v47 = vrot.slane %v2605_v29, %v3342_v8 }
 0xc5a   : > { %v2648_v58 = vpop.f32.mrb[24].mxu0 }
 0xc5b   : > { %v2649_v57 = vadd.f32 %v2648_v58, %v2610_v47  ;;  %v2650_v59 = vpop.f32.mrb[25].mxu0 }
 0xc5c   : > { %v2651_v55 = vadd.f32 %v2650_v59, %v2610_v47  ;;  %v2652_v45 = vpop.f32.mrb[26].mxu0 }
 0xc5d   : > { %v2696_v51 = vmul.f32 0.5, %v2649_v57  ;;  %v2653_v44 = vpop.f32.mrb[27].mxu0 }
 0xc5e   : > { %v2697_v26 = vmul.f32 0.5, %v2651_v55  ;;  %v2689_v35 = vpop.f32.mrb[24].mxu1 }
 0xc5f   : > { %2980 = vtanh.f32 %v2696_v51  ;;  %v2690_v52 = vadd.f32 %v2689_v35, %v2610_v47  ;;  %v2691_v60 = vpop.f32.mrb[25].mxu1 }
 0xc60   : > { %2982 = vtanh.f32 %v2697_v26  ;;  %v2692_v28 = vadd.f32 %v2691_v60, %v2610_v47  ;;  %v2693_v4 = vpop.f32.mrb[26].mxu1 }
 0xc61   : > { %v2698_v61 = vmul.f32 0.5, %v2690_v52  ;;  %v2694_v7 = vpop.f32.mrb[27].mxu1 }
 0xc62   : > { %v2699_v19 = vmul.f32 0.5, %v2692_v28 }
 0xc63   : > { %2984 = vtanh.f32 %v2698_v61 }
 0xc64   : > { %2986 = vtanh.f32 %v2699_v19 }
 0xc69   : > { %v2981_v8 = vpop.eup %2980 }
 0xc6a   : > { %v2983_v13 = vpop.eup %2982  ;;  %v2704_v21 = vadd.f32 1.0, %v2981_v8 }
 0xc6b   : > { %v2705_v34 = vadd.f32 1.0, %v2983_v13 }
 0xc6c   : > { %v2708_v23 = vmul.f32 0.5, %v2704_v21 }
 0xc6d   : > { %v2985_v53 = vpop.eup %2984  ;;  %v2709_v56 = vmul.f32 0.5, %v2705_v34 }
 0xc6e   : > { %v2987_v22 = vpop.eup %2986  ;;  %v2706_v63 = vadd.f32 1.0, %v2985_v53 }
 0xc6f   : > { %v2716_v48 = vcombine.low %v2708_v23, %v2709_v56  ;;  %v2707_v30 = vadd.f32 1.0, %v2987_v22 }
 0xc70   : > { %v2710_v25 = vmul.f32 0.5, %v2706_v63 }
 0xc71   : > { %v2711_v12 = vmul.f32 0.5, %v2707_v30  ;;  %v2724_v2 = vrot.slane %v2716_v48, %v2723_v32 }
 0xc73   : > { %v2717_v27 = vcombine.low %v2710_v25, %v2711_v12 }
 0xc75   : > { %v2731_v14 = vrot.slane %v2717_v27, %v2723_v32 }
 0xc77   : > { %v2732_v15 = vcombine.low %v2724_v2, %v2731_v14 }
 0xc79   : > { %v2739_v33 = vrot.slane %v2732_v15, %v2723_v32 }
 0xc7b   : > { %2745 = vst.msk [vmem:[%s1063_s5] sm:$0xf] %vm2743_vm11, %v2739_v33 }
 0xc7c   : > { %3001 = shalt.err (!%p2998_p3)
}
 0xc7d   : > { %s3002_s5 = scalar_lea.hbm %s3954_s8, 64  ;;  %s3006_s4 = scalar_lea.hbm %s3278_s23, 256 }
 0xc7e   : > { %p3003_p4 = scmp.ne.s32.totalorder %s3954_s8, %s3002_s5  ;;  %p3007_p9 = scmp.lt.u32.totalorder %s3954_s8, %s3278_s23 }
 0xc7f   : > { %p3008_p10 = scmp.lt.u32.totalorder %s3006_s4, %s3002_s5  ;;  %p3010_p12 = scmp.lt.u32.totalorder %s3002_s5, %s3954_s8 }
 0xc80   : > { %p3004_p7 = pnand %p3003_p4, %p3318_p5 }
 0xc81   : > { %p3009_p11 = por %p3008_p10, %p3007_p9 }
 0xc82   : > { %p3005_p8 = pneg %p3004_p7 }
 0xc83   : > { %p3011_p0 = por %p3010_p12, %p3009_p11 }
 0xc85   : > { %p3012_p13 = pnand %p3011_p0, %p3005_p8 }
 0xc87   : > { %3015 = shalt.err (!%p3012_p13)
}
 0xc88   : > { %2891 = dma.vmem_to_hbm [thread:$0]  (%p3318_p5), %s3956_s7, 64, %s3954_s8, %s2747_s9  }
 0xc89 PF: > { %p2897_p1 = scmp.ge.s32.totalorder %s3050_s1, 2  ;;  %s2773_s13 = sand.u32 1, %s3038_s6  }
 0xc8a   : > { %s2774_s14 = scalar_lea.sflag [#allocation4], %s2773_s13 }
 0xc8b   : > { %p2894_p2 = pnand %p2897_p1, %p3322_p6 }
 0xc8d   : > { %3033 = dma.done.wait (!%p2894_p2), %s2774_s14, 64  }
 0xc8e   : > { %3035 = vsyncadd (!%p2894_p2), %s2774_s14, 4294967232  ;;  %p83_p3 = scmp.ge.s32.totalorder %s3305_s12, 6   ;;  %s4069_s6 = smov %s3042_s22 }
 0xc8f   : > { %s4070_s22 = smov %s3046_s26  ;;  %s4071_s26 = smov %s3316_s10 }
 0xc90   : > { %s4072_s1 = smov %s3305_s12  ;;  %85 = sbr.rel (!%p83_p3) target bundleno = 65 (0x41), region = 232 }
 0xc97   :  { %2779 = vsyncpa [#allocation4], 1 }
 0xc98   :  { %2781 = vsyncpa [#allocation4 + $0x1], 1 }

</bundles_post_ra>
